<compile_context>
chip_gen: v7x
topology: tpu7x:2x2x1
jax: 0.10.0
libtpu: 0.0.40
codegen_flags: <defaults>
</compile_context>

<pallas_src>
import numpy as np
import jax
import jax.numpy as jnp
from jax import lax
from jax.experimental import pallas as pl
from jax.experimental.pallas import tpu as pltpu

TEMPERATURE = 0.1
LOSS_WEIGHTS = {
    "info_nce": 1.0, "cls": 1.0, "bio": 0.5, "cloth": 0.5,
    "cloth_adv": 0.1, "cloth_match": 1.0, "decouple": 0.2,
    "gate_regularization": 0.01,
}
LOSS_NAMES = ["info_nce", "cls", "bio", "cloth", "cloth_adv",
              "cloth_match", "decouple", "gate_regularization", "total"]

E_OUT = 256   # projector output dim


# ---------------- in-kernel helpers (traced inside the Pallas body) ----------

def _normalize(x):
    # F.normalize(x, dim=-1) with eps, via EUP rsqrt.
    ss = jnp.sum(x * x, axis=-1, keepdims=True)
    return x * lax.rsqrt(jnp.maximum(ss, 1e-24))


def _eye(n, dtype=jnp.float32):
    r = lax.broadcasted_iota(jnp.int32, (n, n), 0)
    c = lax.broadcasted_iota(jnp.int32, (n, n), 1)
    return (r == c).astype(dtype)


def _row_lse(x):
    m = jnp.max(x, axis=-1, keepdims=True)
    return m + jnp.log(jnp.sum(jnp.exp(x - m), axis=-1, keepdims=True))


def _col_lse(x):
    m = jnp.max(x, axis=0, keepdims=True)
    return m + jnp.log(jnp.sum(jnp.exp(x - m), axis=0, keepdims=True))


def _ce_rows(logits, eye):
    # CrossEntropyLoss(logits, arange(B)) = mean_i [ lse(logits_i) - logits_ii ]
    diag = jnp.sum(logits * eye, axis=-1, keepdims=True)
    return jnp.mean(_row_lse(logits) - diag)


def _ce_cols(logits, eye):
    # CrossEntropyLoss(logits.T, arange(B)) without materializing the transpose
    diag = jnp.sum(logits * eye, axis=0, keepdims=True)
    return jnp.mean(_col_lse(logits) - diag)


# ------------------------------- kernel --------------------------------------

def adv_loss_kernel(img_ref, idtxt_ref, idlog_ref, idemb_ref, cloth_ref,
                    clothtxt_ref, clothimg_ref, pids_ref, gate_ref,
                    wfused_hbm, bfused_ref, out_ref,
                    w_vmem, dma_sem):
    f32 = jnp.float32
    bf16 = jnp.bfloat16
    inv_t = jnp.float32(1.0 / TEMPERATURE)

    # -- start the (dominant) weight DMA immediately; overlap with prologue ----
    w_cp = pltpu.make_async_copy(wfused_hbm, w_vmem, dma_sem)
    w_cp.start()

    # ------------------------- weight-independent prologue --------------------
    img = img_ref[...].astype(f32)
    idtxt = idtxt_ref[...].astype(f32)
    idlog = idlog_ref[...].astype(f32)
    clothtxt = clothtxt_ref[...].astype(f32)
    clothimg = clothimg_ref[...].astype(f32)
    gate = gate_ref[...].astype(f32)

    B = img.shape[0]
    eye = _eye(B)

    img_n = _normalize(img)
    clothimg_n = _normalize(clothimg)
    idtxt_n = _normalize(idtxt)
    clothtxt_n = _normalize(clothtxt)

    # cls: cross entropy of id_logits against pids (weight independent)
    C = idlog.shape[1]
    cls_iota = lax.broadcasted_iota(jnp.int32, (B, C), 1)
    one_hot = (cls_iota == pids_ref[...]).astype(f32)     # pids_ref: (B,1) int32
    cls_diag = jnp.sum(idlog * one_hot, axis=-1, keepdims=True)
    cls_loss = jnp.mean(_row_lse(idlog) - cls_diag)

    # gate regularization: MSE against 0.5 (weight independent)
    gate_reg = jnp.mean((gate - 0.5) ** 2)

    # bf16 LHS for the fused projection (also weight independent)
    proj_lhs = jnp.concatenate(
        [idemb_ref[...].astype(bf16), cloth_ref[...].astype(bf16)], axis=0)

    # ------------- fused 768 -> 512 projection: bf16 MXU, f32 accumulate ------
    w_cp.wait()
    proj = jnp.dot(proj_lhs, w_vmem[...],
                   preferred_element_type=f32) + bfused_ref[...].astype(f32)
    id_proj = _normalize(proj[:B, :E_OUT])          # rows 0:B, cols of W_id
    cloth_proj = _normalize(proj[B:, E_OUT:])       # rows B:2B, cols of W_cloth

    # ---- one fused (4B,256) . (4B,256)^T similarity matmul, bf16 operands ----
    lhs = jnp.concatenate([img_n, id_proj, cloth_proj, clothimg_n],
                          axis=0).astype(bf16)
    rhs = jnp.concatenate([idtxt_n, clothtxt_n, id_proj, cloth_proj],
                          axis=0).astype(bf16)
    sim = lax.dot_general(lhs, rhs, (((1,), (1,)), ((), ())),
                          preferred_element_type=f32)

    # temperature applied post-dot in f32 (bf16 rounding stays on unit-norm vals)
    logits     = sim[0 * B:1 * B, 0 * B:1 * B] * inv_t   # img_n      . idtxt_n^T / T
    bio_logits = sim[1 * B:2 * B, 0 * B:1 * B] * inv_t   # id_proj    . idtxt_n^T / T
    cl_logits  = sim[2 * B:3 * B, 1 * B:2 * B] * inv_t   # cloth_proj . clothtxt_n^T / T
    cm_logits  = sim[3 * B:4 * B, 1 * B:2 * B] * inv_t   # clothimg_n . clothtxt_n^T / T
    idk        = sim[1 * B:2 * B, 2 * B:3 * B]           # id_proj    . id_proj^T
    clk        = sim[2 * B:3 * B, 3 * B:4 * B]           # cloth_proj . cloth_proj^T

    # ---- info_nce / cloth_match: bidirectional CE (t2i via axis-0 reductions)
    info_nce    = 0.5 * (_ce_rows(logits, eye) + _ce_cols(logits, eye))
    cloth_match = 0.5 * (_ce_rows(cm_logits, eye) + _ce_cols(cm_logits, eye))

    # ---- bio / cloth contrastive
    bio        = _ce_rows(bio_logits, eye)
    cloth_loss = _ce_rows(cl_logits, eye)

    # ---- cloth_adv: zero the diagonal, mean of -log_softmax over ALL entries
    #      (epoch=None, so no dynamic adv weight)
    diag_vals = jnp.sum(cl_logits * eye, axis=-1, keepdims=True)
    neg_logits = cl_logits - eye * diag_vals
    cloth_adv = -jnp.mean(neg_logits - _row_lse(neg_logits))

    # ---- decouple: HSIC-style loss between projected id and cloth embeds
    idk_c = idk - eye * jnp.sum(idk * eye, axis=-1, keepdims=True)
    clk_c = clk - eye * jnp.sum(clk * eye, axis=-1, keepdims=True)
    decouple = jnp.mean(idk_c * clk_c) / (B - 1)

    total = (LOSS_WEIGHTS["info_nce"] * info_nce
             + LOSS_WEIGHTS["cls"] * cls_loss
             + LOSS_WEIGHTS["bio"] * bio
             + LOSS_WEIGHTS["cloth"] * cloth_loss
             + LOSS_WEIGHTS["cloth_adv"] * cloth_adv
             + LOSS_WEIGHTS["cloth_match"] * cloth_match
             + LOSS_WEIGHTS["decouple"] * decouple
             + LOSS_WEIGHTS["gate_regularization"] * gate_reg)

    # ---- lane-dense (1,128) epilogue: assemble with iota selects, one vst ----
    vals = [info_nce, cls_loss, bio, cloth_loss, cloth_adv, cloth_match,
            decouple, gate_reg, total]
    lane = lax.broadcasted_iota(jnp.int32, (1, 128), 1)
    acc = jnp.zeros((1, 128), f32)
    for i, v in enumerate(vals):
        acc = jnp.where(lane == i, v, acc)
    out_ref[...] = acc


# ------------------------------- wrapper --------------------------------------

def prepare_projector_params(w_id, b_id, w_cloth, b_cloth):
    """One-time prep (do NOT call per step): fuse the two torch Linear(768,256)
    projectors into a single pre-transposed bf16 weight and a fused f32 bias."""
    w_fused = jnp.concatenate([w_id.T, w_cloth.T], axis=1).astype(jnp.bfloat16)  # (768,512)
    b_fused = jnp.concatenate([b_id, b_cloth]).reshape(1, -1).astype(jnp.float32)  # (1,512)
    return w_fused, b_fused


def _advanced_loss(image_embeds, id_text_embeds, fused_embeds, id_logits,
                   id_embeds, cloth_embeds, cloth_text_embeds,
                   cloth_image_embeds, pids, is_matched,
                   w_fused, b_fused, gate):
    """Mirror of AdvancedLoss.forward at epoch=None.  fused_embeds / is_matched
    are accepted but unused (same as the PyTorch module)."""
    del fused_embeds, is_matched
    B = image_embeds.shape[0]
    D_IN = id_embeds.shape[1]
    pids2d = pids.reshape(B, 1).astype(jnp.int32)

    vmem = pl.BlockSpec(memory_space=pltpu.MemorySpace.VMEM)
    any_spec = pl.BlockSpec(memory_space=pl.ANY)   # weight stays in HBM; manual DMA

    out = pl.pallas_call(
        adv_loss_kernel,
        out_shape=jax.ShapeDtypeStruct((1, 128), jnp.float32),
        in_specs=[vmem] * 9 + [any_spec, vmem],
        out_specs=vmem,
        scratch_shapes=[
            pltpu.VMEM((D_IN, 2 * E_OUT), jnp.bfloat16),   # fused weight buffer
            pltpu.SemaphoreType.DMA,                       # its completion sem
        ],
    )(image_embeds, id_text_embeds, id_logits, id_embeds, cloth_embeds,
      cloth_text_embeds, cloth_image_embeds, pids2d, gate, w_fused, b_fused)

    return {name: out[0, i] for i, name in enumerate(LOSS_NAMES)}


# Jit the whole step so any residual layout plumbing fuses and nothing is
# re-emitted per call.
advanced_loss = jax.jit(_advanced_loss)


# --------------------------- plain-JAX reference -------------------------------

def _ref_losses(image_embeds, id_text_embeds, id_logits, id_embeds, cloth_embeds,
                cloth_text_embeds, cloth_image_embeds, pids, gate,
                w_id, b_id, w_cloth, b_cloth):
    def norm(x):
        return x / jnp.maximum(jnp.linalg.norm(x, axis=-1, keepdims=True), 1e-12)

    def ce(logits, labels):
        lse = jax.scipy.special.logsumexp(logits, axis=-1)
        picked = jnp.take_along_axis(logits, labels[:, None], axis=-1)[:, 0]
        return jnp.mean(lse - picked)

    B = image_embeds.shape[0]
    ar = jnp.arange(B)
    t = TEMPERATURE
    img_n, idtxt_n = norm(image_embeds), norm(id_text_embeds)
    lg = img_n @ idtxt_n.T / t
    info_nce = 0.5 * (ce(lg, ar) + ce(lg.T, ar))
    cls_loss = ce(id_logits, pids)
    id_proj = norm(id_embeds @ w_id.T + b_id)
    cloth_proj = norm(cloth_embeds @ w_cloth.T + b_cloth)
    clothtxt_n, clothimg_n = norm(cloth_text_embeds), norm(cloth_image_embeds)
    bio = ce(id_proj @ idtxt_n.T / t, ar)
    cl_lg = cloth_proj @ clothtxt_n.T / t
    cloth_loss = ce(cl_lg, ar)
    neg = cl_lg - jnp.diag(jnp.diagonal(cl_lg))
    cloth_adv = -jnp.mean(jax.nn.log_softmax(neg, axis=1))
    cm = clothimg_n @ clothtxt_n.T / t
    cloth_match = 0.5 * (ce(cm, ar) + ce(cm.T, ar))
    idk = id_proj @ id_proj.T
    clk = cloth_proj @ cloth_proj.T
    idk = idk - jnp.diag(jnp.diagonal(idk))
    clk = clk - jnp.diag(jnp.diagonal(clk))
    decouple = jnp.mean(idk * clk) / (B - 1)
    gate_reg = jnp.mean((gate - 0.5) ** 2)
    losses = {"info_nce": info_nce, "cls": cls_loss, "bio": bio,
              "cloth": cloth_loss, "cloth_adv": cloth_adv,
              "cloth_match": cloth_match, "decouple": decouple,
              "gate_regularization": gate_reg}
    losses["total"] = sum(LOSS_WEIGHTS[k] * v for k, v in losses.items())
    return losses


# --------------------------------- main ----------------------------------------

if __name__ == "__main__":
    B, E, D_IN, C, G = 8, 256, 768, 16, 16
    key = jax.random.PRNGKey(0)
    ks = jax.random.split(key, 14)

    image_embeds       = jax.random.normal(ks[0], (B, E), jnp.float32)
    id_text_embeds     = jax.random.normal(ks[1], (B, E), jnp.float32)
    fused_embeds       = jax.random.normal(ks[2], (B, E), jnp.float32)   # unused
    id_logits          = jax.random.normal(ks[3], (B, C), jnp.float32)
    id_embeds          = jax.random.normal(ks[4], (B, D_IN), jnp.float32)
    cloth_embeds       = jax.random.normal(ks[5], (B, D_IN), jnp.float32)
    cloth_text_embeds  = jax.random.normal(ks[6], (B, E), jnp.float32)
    cloth_image_embeds = jax.random.normal(ks[7], (B, E), jnp.float32)
    pids               = jax.random.randint(ks[8], (B,), 0, C, jnp.int32)
    is_matched         = jnp.ones((B,), jnp.bool_)                        # unused
    gate               = jax.nn.sigmoid(jax.random.normal(ks[9], (B, G), jnp.float32))

    # deterministic "parameters" for the two nn.Linear(768, 256) projectors
    bound = 1.0 / np.sqrt(D_IN)
    w_id    = jax.random.uniform(ks[10], (E, D_IN), jnp.float32, -bound, bound)
    b_id    = jax.random.uniform(ks[11], (E,),      jnp.float32, -bound, bound)
    w_cloth = jax.random.uniform(ks[12], (E, D_IN), jnp.float32, -bound, bound)
    b_cloth = jax.random.uniform(ks[13], (E,),      jnp.float32, -bound, bound)

    # One-time weight fusion / transpose / bf16 cast (hoisted out of the step).
    w_fused, b_fused = prepare_projector_params(w_id, b_id, w_cloth, b_cloth)
    w_fused, b_fused = jax.block_until_ready((w_fused, b_fused))

    losses = advanced_loss(image_embeds, id_text_embeds, fused_embeds, id_logits,
                           id_embeds, cloth_embeds, cloth_text_embeds,
                           cloth_image_embeds, pids, is_matched,
                           w_fused, b_fused, gate)
    losses = jax.block_until_ready(losses)

    ref = _ref_losses(image_embeds, id_text_embeds, id_logits, id_embeds,
                      cloth_embeds, cloth_text_embeds, cloth_image_embeds,
                      pids, gate, w_id, b_id, w_cloth, b_cloth)
    for k in LOSS_NAMES:
        np.testing.assert_allclose(np.asarray(losses[k]), np.asarray(ref[k]),
                                   rtol=2e-2, atol=2e-2)
    print("KERNEL_OK")
</pallas_src>

<mosaic_0001>
module attributes {stable_mosaic.version = 11 : i64} {
  func.func @adv_loss_kernel(%arg0: memref<8x256xf32, #tpu.memory_space<vmem>>, %arg1: memref<8x256xf32, #tpu.memory_space<vmem>>, %arg2: memref<8x16xf32, #tpu.memory_space<vmem>>, %arg3: memref<8x768xf32, #tpu.memory_space<vmem>>, %arg4: memref<8x768xf32, #tpu.memory_space<vmem>>, %arg5: memref<8x256xf32, #tpu.memory_space<vmem>>, %arg6: memref<8x256xf32, #tpu.memory_space<vmem>>, %arg7: memref<8x1xi32, #tpu.memory_space<vmem>>, %arg8: memref<8x16xf32, #tpu.memory_space<vmem>>, %arg9: memref<768x512xbf16, #tpu.memory_space<any>>, %arg10: memref<1x512xf32, #tpu.memory_space<vmem>>, %arg11: memref<1x128xf32, #tpu.memory_space<vmem>>, %arg12: memref<768x512xbf16, #tpu.memory_space<vmem>>, %arg13: memref<!tpu.dma_semaphore, #tpu.memory_space<semaphore_mem>>) attributes {dimension_semantics = [], scalar_prefetch = 0 : i64, scratch_operands = 2 : i64, tpu.core_type = #tpu.core_type<tc>} {
    tpu.enqueue_dma source(%arg9 : memref<768x512xbf16, #tpu.memory_space<any>>) target(%arg12 : memref<768x512xbf16, #tpu.memory_space<vmem>>) target_semaphore(%arg13 : memref<!tpu.dma_semaphore, #tpu.memory_space<semaphore_mem>>)
    %c0 = arith.constant 0 : index
    %c0_0 = arith.constant 0 : index
    %0 = vector.load %arg0[%c0, %c0_0] : memref<8x256xf32, #tpu.memory_space<vmem>>, vector<8x256xf32>
    %c0_1 = arith.constant 0 : index
    %c0_2 = arith.constant 0 : index
    %1 = vector.load %arg1[%c0_1, %c0_2] : memref<8x256xf32, #tpu.memory_space<vmem>>, vector<8x256xf32>
    %c0_3 = arith.constant 0 : index
    %c0_4 = arith.constant 0 : index
    %2 = vector.load %arg2[%c0_3, %c0_4] : memref<8x16xf32, #tpu.memory_space<vmem>>, vector<8x16xf32>
    %c0_5 = arith.constant 0 : index
    %c0_6 = arith.constant 0 : index
    %3 = vector.load %arg5[%c0_5, %c0_6] : memref<8x256xf32, #tpu.memory_space<vmem>>, vector<8x256xf32>
    %c0_7 = arith.constant 0 : index
    %c0_8 = arith.constant 0 : index
    %4 = vector.load %arg6[%c0_7, %c0_8] : memref<8x256xf32, #tpu.memory_space<vmem>>, vector<8x256xf32>
    %c0_9 = arith.constant 0 : index
    %c0_10 = arith.constant 0 : index
    %5 = vector.load %arg8[%c0_9, %c0_10] : memref<8x16xf32, #tpu.memory_space<vmem>>, vector<8x16xf32>
    %6 = tpu.iota {dimensions = array<i32: 0>} : vector<8x8xi32>
    %7 = tpu.iota {dimensions = array<i32: 1>} : vector<8x8xi32>
    %8 = arith.cmpi eq, %6, %7 : vector<8x8xi32>
    %9 = arith.extui %8 : vector<8x8xi1> to vector<8x8xi32>
    %10 = arith.sitofp %9 : vector<8x8xi32> to vector<8x8xf32>
    %11 = arith.mulf %0, %0 : vector<8x256xf32>
    %cst = arith.constant dense<0.000000e+00> : vector<8xf32>
    %12 = vector.multi_reduction <add>, %11, %cst [1] : vector<8x256xf32> to vector<8xf32>
    %13 = vector.shape_cast %12 : vector<8xf32> to vector<8x1xf32>
    %cst_11 = arith.constant 1.000000e-24 : f32
    %14 = vector.broadcast %cst_11 : f32 to vector<8x1xf32>
    %15 = arith.maximumf %13, %14 : vector<8x1xf32>
    %16 = math.rsqrt %15 : vector<8x1xf32>
    %17 = vector.broadcast %16 : vector<8x1xf32> to vector<8x256xf32>
    %18 = arith.mulf %0, %17 : vector<8x256xf32>
    %19 = arith.mulf %4, %4 : vector<8x256xf32>
    %cst_12 = arith.constant dense<0.000000e+00> : vector<8xf32>
    %20 = vector.multi_reduction <add>, %19, %cst_12 [1] : vector<8x256xf32> to vector<8xf32>
    %21 = vector.shape_cast %20 : vector<8xf32> to vector<8x1xf32>
    %cst_13 = arith.constant 1.000000e-24 : f32
    %22 = vector.broadcast %cst_13 : f32 to vector<8x1xf32>
    %23 = arith.maximumf %21, %22 : vector<8x1xf32>
    %24 = math.rsqrt %23 : vector<8x1xf32>
    %25 = vector.broadcast %24 : vector<8x1xf32> to vector<8x256xf32>
    %26 = arith.mulf %4, %25 : vector<8x256xf32>
    %27 = arith.mulf %1, %1 : vector<8x256xf32>
    %cst_14 = arith.constant dense<0.000000e+00> : vector<8xf32>
    %28 = vector.multi_reduction <add>, %27, %cst_14 [1] : vector<8x256xf32> to vector<8xf32>
    %29 = vector.shape_cast %28 : vector<8xf32> to vector<8x1xf32>
    %cst_15 = arith.constant 1.000000e-24 : f32
    %30 = vector.broadcast %cst_15 : f32 to vector<8x1xf32>
    %31 = arith.maximumf %29, %30 : vector<8x1xf32>
    %32 = math.rsqrt %31 : vector<8x1xf32>
    %33 = vector.broadcast %32 : vector<8x1xf32> to vector<8x256xf32>
    %34 = arith.mulf %1, %33 : vector<8x256xf32>
    %35 = arith.mulf %3, %3 : vector<8x256xf32>
    %cst_16 = arith.constant dense<0.000000e+00> : vector<8xf32>
    %36 = vector.multi_reduction <add>, %35, %cst_16 [1] : vector<8x256xf32> to vector<8xf32>
    %37 = vector.shape_cast %36 : vector<8xf32> to vector<8x1xf32>
    %cst_17 = arith.constant 1.000000e-24 : f32
    %38 = vector.broadcast %cst_17 : f32 to vector<8x1xf32>
    %39 = arith.maximumf %37, %38 : vector<8x1xf32>
    %40 = math.rsqrt %39 : vector<8x1xf32>
    %41 = vector.broadcast %40 : vector<8x1xf32> to vector<8x256xf32>
    %42 = arith.mulf %3, %41 : vector<8x256xf32>
    %43 = tpu.iota {dimensions = array<i32: 1>} : vector<8x16xi32>
    %c0_18 = arith.constant 0 : index
    %c0_19 = arith.constant 0 : index
    %44 = vector.load %arg7[%c0_18, %c0_19] : memref<8x1xi32, #tpu.memory_space<vmem>>, vector<8x1xi32>
    %45 = vector.broadcast %44 : vector<8x1xi32> to vector<8x16xi32>
    %46 = arith.cmpi eq, %43, %45 : vector<8x16xi32>
    %47 = arith.extui %46 : vector<8x16xi1> to vector<8x16xi32>
    %48 = arith.sitofp %47 : vector<8x16xi32> to vector<8x16xf32>
    %49 = arith.mulf %2, %48 : vector<8x16xf32>
    %cst_20 = arith.constant dense<0.000000e+00> : vector<8xf32>
    %50 = vector.multi_reduction <add>, %49, %cst_20 [1] : vector<8x16xf32> to vector<8xf32>
    %51 = vector.shape_cast %50 : vector<8xf32> to vector<8x1xf32>
    %cst_21 = arith.constant dense<0xFF800000> : vector<8xf32>
    %52 = vector.multi_reduction <maximumf>, %2, %cst_21 [1] : vector<8x16xf32> to vector<8xf32>
    %53 = vector.shape_cast %52 : vector<8xf32> to vector<8x1xf32>
    %54 = vector.broadcast %53 : vector<8x1xf32> to vector<8x16xf32>
    %55 = arith.subf %2, %54 : vector<8x16xf32>
    %56 = math.exp %55 : vector<8x16xf32>
    %cst_22 = arith.constant dense<0.000000e+00> : vector<8xf32>
    %57 = vector.multi_reduction <add>, %56, %cst_22 [1] : vector<8x16xf32> to vector<8xf32>
    %58 = vector.shape_cast %57 : vector<8xf32> to vector<8x1xf32>
    %59 = math.log %58 : vector<8x1xf32>
    %60 = arith.addf %53, %59 : vector<8x1xf32>
    %61 = arith.subf %60, %51 : vector<8x1xf32>
    %62 = vector.shape_cast %61 : vector<8x1xf32> to vector<1x8x1xf32>
    %cst_23 = arith.constant dense<0.000000e+00> : vector<1xf32>
    %63 = vector.multi_reduction <add>, %62, %cst_23 [1, 2] : vector<1x8x1xf32> to vector<1xf32>
    %64 = vector.shape_cast %63 : vector<1xf32> to vector<1x1x1xf32>
    %65 = vector.extract %64[0, 0, 0] : f32 from vector<1x1x1xf32>
    %cst_24 = arith.constant 8.000000e+00 : f32
    %66 = arith.divf %65, %cst_24 : f32
    %cst_25 = arith.constant 5.000000e-01 : f32
    %67 = vector.broadcast %cst_25 : f32 to vector<8x16xf32>
    %68 = arith.subf %5, %67 : vector<8x16xf32>
    %69 = arith.mulf %68, %68 : vector<8x16xf32>
    %70 = vector.shape_cast %69 : vector<8x16xf32> to vector<1x8x16xf32>
    %cst_26 = arith.constant dense<0.000000e+00> : vector<1xf32>
    %71 = vector.multi_reduction <add>, %70, %cst_26 [1, 2] : vector<1x8x16xf32> to vector<1xf32>
    %72 = vector.shape_cast %71 : vector<1xf32> to vector<1x1x1xf32>
    %73 = vector.extract %72[0, 0, 0] : f32 from vector<1x1x1xf32>
    %cst_27 = arith.constant 1.280000e+02 : f32
    %74 = arith.divf %73, %cst_27 : f32
    %c0_28 = arith.constant 0 : index
    %c0_29 = arith.constant 0 : index
    %75 = vector.load %arg3[%c0_28, %c0_29] : memref<8x768xf32, #tpu.memory_space<vmem>>, vector<8x768xf32>
    %76 = arith.truncf %75 : vector<8x768xf32> to vector<8x768xbf16>
    %c0_30 = arith.constant 0 : index
    %c0_31 = arith.constant 0 : index
    %77 = vector.load %arg4[%c0_30, %c0_31] : memref<8x768xf32, #tpu.memory_space<vmem>>, vector<8x768xf32>
    %78 = arith.truncf %77 : vector<8x768xf32> to vector<8x768xbf16>
    %79 = tpu.concatenate %76, %78 in 0 : vector<8x768xbf16>, vector<8x768xbf16> -> vector<16x768xbf16>
    tpu.wait_dma2 semaphore(%arg13 : memref<!tpu.dma_semaphore, #tpu.memory_space<semaphore_mem>>) src(%arg9 : memref<768x512xbf16, #tpu.memory_space<any>>) dst(%arg12 : memref<768x512xbf16, #tpu.memory_space<vmem>>)
    %c0_32 = arith.constant 0 : index
    %c0_33 = arith.constant 0 : index
    %80 = vector.load %arg12[%c0_32, %c0_33] : memref<768x512xbf16, #tpu.memory_space<vmem>>, vector<768x512xbf16>
    %cst_34 = arith.constant dense<0.000000e+00> : vector<16x512xf32>
    %81 = tpu.matmul %79, %80, %cst_34 {dimension_numbers = #tpu.dot_dimension_numbers<[1], [0], [0], [1], [0, 0, 1, 1], [], []>} : vector<16x768xbf16>, vector<768x512xbf16>, vector<16x512xf32> -> vector<16x512xf32>
    %c0_35 = arith.constant 0 : index
    %c0_36 = arith.constant 0 : index
    %82 = vector.load %arg10[%c0_35, %c0_36] : memref<1x512xf32, #tpu.memory_space<vmem>>, vector<1x512xf32>
    %83 = vector.broadcast %82 : vector<1x512xf32> to vector<16x512xf32>
    %84 = arith.addf %81, %83 : vector<16x512xf32>
    %85 = vector.extract_strided_slice %84 {offsets = [0, 0], sizes = [8, 256], strides = [1, 1]} : vector<16x512xf32> to vector<8x256xf32>
    %86 = arith.mulf %85, %85 : vector<8x256xf32>
    %cst_37 = arith.constant dense<0.000000e+00> : vector<8xf32>
    %87 = vector.multi_reduction <add>, %86, %cst_37 [1] : vector<8x256xf32> to vector<8xf32>
    %88 = vector.shape_cast %87 : vector<8xf32> to vector<8x1xf32>
    %cst_38 = arith.constant 1.000000e-24 : f32
    %89 = vector.broadcast %cst_38 : f32 to vector<8x1xf32>
    %90 = arith.maximumf %88, %89 : vector<8x1xf32>
    %91 = math.rsqrt %90 : vector<8x1xf32>
    %92 = vector.broadcast %91 : vector<8x1xf32> to vector<8x256xf32>
    %93 = arith.mulf %85, %92 : vector<8x256xf32>
    %94 = vector.extract_strided_slice %84 {offsets = [8, 256], sizes = [8, 256], strides = [1, 1]} : vector<16x512xf32> to vector<8x256xf32>
    %95 = arith.mulf %94, %94 : vector<8x256xf32>
    %cst_39 = arith.constant dense<0.000000e+00> : vector<8xf32>
    %96 = vector.multi_reduction <add>, %95, %cst_39 [1] : vector<8x256xf32> to vector<8xf32>
    %97 = vector.shape_cast %96 : vector<8xf32> to vector<8x1xf32>
    %cst_40 = arith.constant 1.000000e-24 : f32
    %98 = vector.broadcast %cst_40 : f32 to vector<8x1xf32>
    %99 = arith.maximumf %97, %98 : vector<8x1xf32>
    %100 = math.rsqrt %99 : vector<8x1xf32>
    %101 = vector.broadcast %100 : vector<8x1xf32> to vector<8x256xf32>
    %102 = arith.mulf %94, %101 : vector<8x256xf32>
    %103 = tpu.concatenate %18, %93, %102, %26 in 0 : vector<8x256xf32>, vector<8x256xf32>, vector<8x256xf32>, vector<8x256xf32> -> vector<32x256xf32>
    %104 = arith.truncf %103 : vector<32x256xf32> to vector<32x256xbf16>
    %105 = tpu.concatenate %34, %42, %93, %102 in 0 : vector<8x256xf32>, vector<8x256xf32>, vector<8x256xf32>, vector<8x256xf32> -> vector<32x256xf32>
    %106 = arith.truncf %105 : vector<32x256xf32> to vector<32x256xbf16>
    %cst_41 = arith.constant dense<0.000000e+00> : vector<32x32xf32>
    %107 = tpu.matmul %104, %106, %cst_41 {dimension_numbers = #tpu.dot_dimension_numbers<[1], [1], [0], [0], [0, 0, 1, 0], [], []>} : vector<32x256xbf16>, vector<32x256xbf16>, vector<32x32xf32> -> vector<32x32xf32>
    %108 = vector.extract_strided_slice %107 {offsets = [0, 0], sizes = [8, 8], strides = [1, 1]} : vector<32x32xf32> to vector<8x8xf32>
    %cst_42 = arith.constant 1.000000e+01 : f32
    %109 = vector.broadcast %cst_42 : f32 to vector<8x8xf32>
    %110 = arith.mulf %108, %109 : vector<8x8xf32>
    %111 = vector.extract_strided_slice %107 {offsets = [8, 0], sizes = [8, 8], strides = [1, 1]} : vector<32x32xf32> to vector<8x8xf32>
    %cst_43 = arith.constant 1.000000e+01 : f32
    %112 = vector.broadcast %cst_43 : f32 to vector<8x8xf32>
    %113 = arith.mulf %111, %112 : vector<8x8xf32>
    %114 = vector.extract_strided_slice %107 {offsets = [16, 8], sizes = [8, 8], strides = [1, 1]} : vector<32x32xf32> to vector<8x8xf32>
    %cst_44 = arith.constant 1.000000e+01 : f32
    %115 = vector.broadcast %cst_44 : f32 to vector<8x8xf32>
    %116 = arith.mulf %114, %115 : vector<8x8xf32>
    %117 = vector.extract_strided_slice %107 {offsets = [24, 8], sizes = [8, 8], strides = [1, 1]} : vector<32x32xf32> to vector<8x8xf32>
    %cst_45 = arith.constant 1.000000e+01 : f32
    %118 = vector.broadcast %cst_45 : f32 to vector<8x8xf32>
    %119 = arith.mulf %117, %118 : vector<8x8xf32>
    %120 = vector.extract_strided_slice %107 {offsets = [8, 16], sizes = [8, 8], strides = [1, 1]} : vector<32x32xf32> to vector<8x8xf32>
    %121 = vector.extract_strided_slice %107 {offsets = [16, 24], sizes = [8, 8], strides = [1, 1]} : vector<32x32xf32> to vector<8x8xf32>
    %122 = arith.mulf %110, %10 : vector<8x8xf32>
    %cst_46 = arith.constant dense<0.000000e+00> : vector<8xf32>
    %123 = vector.multi_reduction <add>, %122, %cst_46 [1] : vector<8x8xf32> to vector<8xf32>
    %124 = vector.shape_cast %123 : vector<8xf32> to vector<8x1xf32>
    %cst_47 = arith.constant dense<0xFF800000> : vector<8xf32>
    %125 = vector.multi_reduction <maximumf>, %110, %cst_47 [1] : vector<8x8xf32> to vector<8xf32>
    %126 = vector.shape_cast %125 : vector<8xf32> to vector<8x1xf32>
    %127 = vector.broadcast %126 : vector<8x1xf32> to vector<8x8xf32>
    %128 = arith.subf %110, %127 : vector<8x8xf32>
    %129 = math.exp %128 : vector<8x8xf32>
    %cst_48 = arith.constant dense<0.000000e+00> : vector<8xf32>
    %130 = vector.multi_reduction <add>, %129, %cst_48 [1] : vector<8x8xf32> to vector<8xf32>
    %131 = vector.shape_cast %130 : vector<8xf32> to vector<8x1xf32>
    %132 = math.log %131 : vector<8x1xf32>
    %133 = arith.addf %126, %132 : vector<8x1xf32>
    %134 = arith.subf %133, %124 : vector<8x1xf32>
    %135 = vector.shape_cast %134 : vector<8x1xf32> to vector<1x8x1xf32>
    %cst_49 = arith.constant dense<0.000000e+00> : vector<1xf32>
    %136 = vector.multi_reduction <add>, %135, %cst_49 [1, 2] : vector<1x8x1xf32> to vector<1xf32>
    %137 = vector.shape_cast %136 : vector<1xf32> to vector<1x1x1xf32>
    %138 = vector.extract %137[0, 0, 0] : f32 from vector<1x1x1xf32>
    %cst_50 = arith.constant 8.000000e+00 : f32
    %139 = arith.divf %138, %cst_50 : f32
    %140 = arith.mulf %110, %10 : vector<8x8xf32>
    %cst_51 = arith.constant dense<0.000000e+00> : vector<8xf32>
    %141 = vector.multi_reduction <add>, %140, %cst_51 [0] : vector<8x8xf32> to vector<8xf32>
    %142 = vector.shape_cast %141 : vector<8xf32> to vector<1x8xf32>
    %cst_52 = arith.constant dense<0xFF800000> : vector<8xf32>
    %143 = vector.multi_reduction <maximumf>, %110, %cst_52 [0] : vector<8x8xf32> to vector<8xf32>
    %144 = vector.shape_cast %143 : vector<8xf32> to vector<1x8xf32>
    %145 = vector.broadcast %144 : vector<1x8xf32> to vector<8x8xf32>
    %146 = arith.subf %110, %145 : vector<8x8xf32>
    %147 = math.exp %146 : vector<8x8xf32>
    %cst_53 = arith.constant dense<0.000000e+00> : vector<8xf32>
    %148 = vector.multi_reduction <add>, %147, %cst_53 [0] : vector<8x8xf32> to vector<8xf32>
    %149 = vector.shape_cast %148 : vector<8xf32> to vector<1x8xf32>
    %150 = math.log %149 : vector<1x8xf32>
    %151 = arith.addf %144, %150 : vector<1x8xf32>
    %152 = arith.subf %151, %142 : vector<1x8xf32>
    %153 = vector.shape_cast %152 : vector<1x8xf32> to vector<1x1x8xf32>
    %cst_54 = arith.constant dense<0.000000e+00> : vector<1xf32>
    %154 = vector.multi_reduction <add>, %153, %cst_54 [1, 2] : vector<1x1x8xf32> to vector<1xf32>
    %155 = vector.shape_cast %154 : vector<1xf32> to vector<1x1x1xf32>
    %156 = vector.extract %155[0, 0, 0] : f32 from vector<1x1x1xf32>
    %cst_55 = arith.constant 8.000000e+00 : f32
    %157 = arith.divf %156, %cst_55 : f32
    %158 = arith.addf %139, %157 : f32
    %cst_56 = arith.constant 5.000000e-01 : f32
    %159 = arith.mulf %cst_56, %158 : f32
    %160 = arith.mulf %119, %10 : vector<8x8xf32>
    %cst_57 = arith.constant dense<0.000000e+00> : vector<8xf32>
    %161 = vector.multi_reduction <add>, %160, %cst_57 [1] : vector<8x8xf32> to vector<8xf32>
    %162 = vector.shape_cast %161 : vector<8xf32> to vector<8x1xf32>
    %cst_58 = arith.constant dense<0xFF800000> : vector<8xf32>
    %163 = vector.multi_reduction <maximumf>, %119, %cst_58 [1] : vector<8x8xf32> to vector<8xf32>
    %164 = vector.shape_cast %163 : vector<8xf32> to vector<8x1xf32>
    %165 = vector.broadcast %164 : vector<8x1xf32> to vector<8x8xf32>
    %166 = arith.subf %119, %165 : vector<8x8xf32>
    %167 = math.exp %166 : vector<8x8xf32>
    %cst_59 = arith.constant dense<0.000000e+00> : vector<8xf32>
    %168 = vector.multi_reduction <add>, %167, %cst_59 [1] : vector<8x8xf32> to vector<8xf32>
    %169 = vector.shape_cast %168 : vector<8xf32> to vector<8x1xf32>
    %170 = math.log %169 : vector<8x1xf32>
    %171 = arith.addf %164, %170 : vector<8x1xf32>
    %172 = arith.subf %171, %162 : vector<8x1xf32>
    %173 = vector.shape_cast %172 : vector<8x1xf32> to vector<1x8x1xf32>
    %cst_60 = arith.constant dense<0.000000e+00> : vector<1xf32>
    %174 = vector.multi_reduction <add>, %173, %cst_60 [1, 2] : vector<1x8x1xf32> to vector<1xf32>
    %175 = vector.shape_cast %174 : vector<1xf32> to vector<1x1x1xf32>
    %176 = vector.extract %175[0, 0, 0] : f32 from vector<1x1x1xf32>
    %cst_61 = arith.constant 8.000000e+00 : f32
    %177 = arith.divf %176, %cst_61 : f32
    %178 = arith.mulf %119, %10 : vector<8x8xf32>
    %cst_62 = arith.constant dense<0.000000e+00> : vector<8xf32>
    %179 = vector.multi_reduction <add>, %178, %cst_62 [0] : vector<8x8xf32> to vector<8xf32>
    %180 = vector.shape_cast %179 : vector<8xf32> to vector<1x8xf32>
    %cst_63 = arith.constant dense<0xFF800000> : vector<8xf32>
    %181 = vector.multi_reduction <maximumf>, %119, %cst_63 [0] : vector<8x8xf32> to vector<8xf32>
    %182 = vector.shape_cast %181 : vector<8xf32> to vector<1x8xf32>
    %183 = vector.broadcast %182 : vector<1x8xf32> to vector<8x8xf32>
    %184 = arith.subf %119, %183 : vector<8x8xf32>
    %185 = math.exp %184 : vector<8x8xf32>
    %cst_64 = arith.constant dense<0.000000e+00> : vector<8xf32>
    %186 = vector.multi_reduction <add>, %185, %cst_64 [0] : vector<8x8xf32> to vector<8xf32>
    %187 = vector.shape_cast %186 : vector<8xf32> to vector<1x8xf32>
    %188 = math.log %187 : vector<1x8xf32>
    %189 = arith.addf %182, %188 : vector<1x8xf32>
    %190 = arith.subf %189, %180 : vector<1x8xf32>
    %191 = vector.shape_cast %190 : vector<1x8xf32> to vector<1x1x8xf32>
    %cst_65 = arith.constant dense<0.000000e+00> : vector<1xf32>
    %192 = vector.multi_reduction <add>, %191, %cst_65 [1, 2] : vector<1x1x8xf32> to vector<1xf32>
    %193 = vector.shape_cast %192 : vector<1xf32> to vector<1x1x1xf32>
    %194 = vector.extract %193[0, 0, 0] : f32 from vector<1x1x1xf32>
    %cst_66 = arith.constant 8.000000e+00 : f32
    %195 = arith.divf %194, %cst_66 : f32
    %196 = arith.addf %177, %195 : f32
    %cst_67 = arith.constant 5.000000e-01 : f32
    %197 = arith.mulf %cst_67, %196 : f32
    %198 = arith.mulf %113, %10 : vector<8x8xf32>
    %cst_68 = arith.constant dense<0.000000e+00> : vector<8xf32>
    %199 = vector.multi_reduction <add>, %198, %cst_68 [1] : vector<8x8xf32> to vector<8xf32>
    %200 = vector.shape_cast %199 : vector<8xf32> to vector<8x1xf32>
    %cst_69 = arith.constant dense<0xFF800000> : vector<8xf32>
    %201 = vector.multi_reduction <maximumf>, %113, %cst_69 [1] : vector<8x8xf32> to vector<8xf32>
    %202 = vector.shape_cast %201 : vector<8xf32> to vector<8x1xf32>
    %203 = vector.broadcast %202 : vector<8x1xf32> to vector<8x8xf32>
    %204 = arith.subf %113, %203 : vector<8x8xf32>
    %205 = math.exp %204 : vector<8x8xf32>
    %cst_70 = arith.constant dense<0.000000e+00> : vector<8xf32>
    %206 = vector.multi_reduction <add>, %205, %cst_70 [1] : vector<8x8xf32> to vector<8xf32>
    %207 = vector.shape_cast %206 : vector<8xf32> to vector<8x1xf32>
    %208 = math.log %207 : vector<8x1xf32>
    %209 = arith.addf %202, %208 : vector<8x1xf32>
    %210 = arith.subf %209, %200 : vector<8x1xf32>
    %211 = vector.shape_cast %210 : vector<8x1xf32> to vector<1x8x1xf32>
    %cst_71 = arith.constant dense<0.000000e+00> : vector<1xf32>
    %212 = vector.multi_reduction <add>, %211, %cst_71 [1, 2] : vector<1x8x1xf32> to vector<1xf32>
    %213 = vector.shape_cast %212 : vector<1xf32> to vector<1x1x1xf32>
    %214 = vector.extract %213[0, 0, 0] : f32 from vector<1x1x1xf32>
    %cst_72 = arith.constant 8.000000e+00 : f32
    %215 = arith.divf %214, %cst_72 : f32
    %216 = arith.mulf %116, %10 : vector<8x8xf32>
    %cst_73 = arith.constant dense<0.000000e+00> : vector<8xf32>
    %217 = vector.multi_reduction <add>, %216, %cst_73 [1] : vector<8x8xf32> to vector<8xf32>
    %218 = vector.shape_cast %217 : vector<8xf32> to vector<8x1xf32>
    %cst_74 = arith.constant dense<0xFF800000> : vector<8xf32>
    %219 = vector.multi_reduction <maximumf>, %116, %cst_74 [1] : vector<8x8xf32> to vector<8xf32>
    %220 = vector.shape_cast %219 : vector<8xf32> to vector<8x1xf32>
    %221 = vector.broadcast %220 : vector<8x1xf32> to vector<8x8xf32>
    %222 = arith.subf %116, %221 : vector<8x8xf32>
    %223 = math.exp %222 : vector<8x8xf32>
    %cst_75 = arith.constant dense<0.000000e+00> : vector<8xf32>
    %224 = vector.multi_reduction <add>, %223, %cst_75 [1] : vector<8x8xf32> to vector<8xf32>
    %225 = vector.shape_cast %224 : vector<8xf32> to vector<8x1xf32>
    %226 = math.log %225 : vector<8x1xf32>
    %227 = arith.addf %220, %226 : vector<8x1xf32>
    %228 = arith.subf %227, %218 : vector<8x1xf32>
    %229 = vector.shape_cast %228 : vector<8x1xf32> to vector<1x8x1xf32>
    %cst_76 = arith.constant dense<0.000000e+00> : vector<1xf32>
    %230 = vector.multi_reduction <add>, %229, %cst_76 [1, 2] : vector<1x8x1xf32> to vector<1xf32>
    %231 = vector.shape_cast %230 : vector<1xf32> to vector<1x1x1xf32>
    %232 = vector.extract %231[0, 0, 0] : f32 from vector<1x1x1xf32>
    %cst_77 = arith.constant 8.000000e+00 : f32
    %233 = arith.divf %232, %cst_77 : f32
    %234 = arith.mulf %116, %10 : vector<8x8xf32>
    %cst_78 = arith.constant dense<0.000000e+00> : vector<8xf32>
    %235 = vector.multi_reduction <add>, %234, %cst_78 [1] : vector<8x8xf32> to vector<8xf32>
    %236 = vector.shape_cast %235 : vector<8xf32> to vector<8x1xf32>
    %237 = vector.broadcast %236 : vector<8x1xf32> to vector<8x8xf32>
    %238 = arith.mulf %10, %237 : vector<8x8xf32>
    %239 = arith.subf %116, %238 : vector<8x8xf32>
    %cst_79 = arith.constant dense<0xFF800000> : vector<8xf32>
    %240 = vector.multi_reduction <maximumf>, %239, %cst_79 [1] : vector<8x8xf32> to vector<8xf32>
    %241 = vector.shape_cast %240 : vector<8xf32> to vector<8x1xf32>
    %242 = vector.broadcast %241 : vector<8x1xf32> to vector<8x8xf32>
    %243 = arith.subf %239, %242 : vector<8x8xf32>
    %244 = math.exp %243 : vector<8x8xf32>
    %cst_80 = arith.constant dense<0.000000e+00> : vector<8xf32>
    %245 = vector.multi_reduction <add>, %244, %cst_80 [1] : vector<8x8xf32> to vector<8xf32>
    %246 = vector.shape_cast %245 : vector<8xf32> to vector<8x1xf32>
    %247 = math.log %246 : vector<8x1xf32>
    %248 = arith.addf %241, %247 : vector<8x1xf32>
    %249 = vector.broadcast %248 : vector<8x1xf32> to vector<8x8xf32>
    %250 = arith.subf %239, %249 : vector<8x8xf32>
    %251 = vector.shape_cast %250 : vector<8x8xf32> to vector<1x8x8xf32>
    %cst_81 = arith.constant dense<0.000000e+00> : vector<1xf32>
    %252 = vector.multi_reduction <add>, %251, %cst_81 [1, 2] : vector<1x8x8xf32> to vector<1xf32>
    %253 = vector.shape_cast %252 : vector<1xf32> to vector<1x1x1xf32>
    %254 = vector.extract %253[0, 0, 0] : f32 from vector<1x1x1xf32>
    %cst_82 = arith.constant 6.400000e+01 : f32
    %255 = arith.divf %254, %cst_82 : f32
    %cst_83 = arith.constant 0.000000e+00 : f32
    %256 = arith.subf %cst_83, %255 : f32
    %257 = arith.mulf %120, %10 : vector<8x8xf32>
    %cst_84 = arith.constant dense<0.000000e+00> : vector<8xf32>
    %258 = vector.multi_reduction <add>, %257, %cst_84 [1] : vector<8x8xf32> to vector<8xf32>
    %259 = vector.shape_cast %258 : vector<8xf32> to vector<8x1xf32>
    %260 = vector.broadcast %259 : vector<8x1xf32> to vector<8x8xf32>
    %261 = arith.mulf %10, %260 : vector<8x8xf32>
    %262 = arith.subf %120, %261 : vector<8x8xf32>
    %263 = arith.mulf %121, %10 : vector<8x8xf32>
    %cst_85 = arith.constant dense<0.000000e+00> : vector<8xf32>
    %264 = vector.multi_reduction <add>, %263, %cst_85 [1] : vector<8x8xf32> to vector<8xf32>
    %265 = vector.shape_cast %264 : vector<8xf32> to vector<8x1xf32>
    %266 = vector.broadcast %265 : vector<8x1xf32> to vector<8x8xf32>
    %267 = arith.mulf %10, %266 : vector<8x8xf32>
    %268 = arith.subf %121, %267 : vector<8x8xf32>
    %269 = arith.mulf %262, %268 : vector<8x8xf32>
    %270 = vector.shape_cast %269 : vector<8x8xf32> to vector<1x8x8xf32>
    %cst_86 = arith.constant dense<0.000000e+00> : vector<1xf32>
    %271 = vector.multi_reduction <add>, %270, %cst_86 [1, 2] : vector<1x8x8xf32> to vector<1xf32>
    %272 = vector.shape_cast %271 : vector<1xf32> to vector<1x1x1xf32>
    %273 = vector.extract %272[0, 0, 0] : f32 from vector<1x1x1xf32>
    %cst_87 = arith.constant 6.400000e+01 : f32
    %274 = arith.divf %273, %cst_87 : f32
    %cst_88 = arith.constant 7.000000e+00 : f32
    %275 = arith.divf %274, %cst_88 : f32
    %cst_89 = arith.constant 1.000000e+00 : f32
    %276 = arith.mulf %cst_89, %159 : f32
    %cst_90 = arith.constant 1.000000e+00 : f32
    %277 = arith.mulf %cst_90, %66 : f32
    %278 = arith.addf %276, %277 : f32
    %cst_91 = arith.constant 5.000000e-01 : f32
    %279 = arith.mulf %cst_91, %215 : f32
    %280 = arith.addf %278, %279 : f32
    %cst_92 = arith.constant 5.000000e-01 : f32
    %281 = arith.mulf %cst_92, %233 : f32
    %282 = arith.addf %280, %281 : f32
    %cst_93 = arith.constant 1.000000e-01 : f32
    %283 = arith.mulf %cst_93, %256 : f32
    %284 = arith.addf %282, %283 : f32
    %cst_94 = arith.constant 1.000000e+00 : f32
    %285 = arith.mulf %cst_94, %197 : f32
    %286 = arith.addf %284, %285 : f32
    %cst_95 = arith.constant 2.000000e-01 : f32
    %287 = arith.mulf %cst_95, %275 : f32
    %288 = arith.addf %286, %287 : f32
    %cst_96 = arith.constant 0.00999999977 : f32
    %289 = arith.mulf %cst_96, %74 : f32
    %290 = arith.addf %288, %289 : f32
    %291 = tpu.iota {dimensions = array<i32: 1>} : vector<1x128xi32>
    %cst_97 = arith.constant 0.000000e+00 : f32
    %292 = vector.broadcast %cst_97 : f32 to vector<1x128xf32>
    %c0_i32 = arith.constant 0 : i32
    %293 = vector.broadcast %c0_i32 : i32 to vector<1x128xi32>
    %294 = arith.cmpi eq, %291, %293 : vector<1x128xi32>
    %295 = vector.broadcast %159 : f32 to vector<1x128xf32>
    %296 = arith.select %294, %295, %292 : vector<1x128xi1>, vector<1x128xf32>
    %c1_i32 = arith.constant 1 : i32
    %297 = vector.broadcast %c1_i32 : i32 to vector<1x128xi32>
    %298 = arith.cmpi eq, %291, %297 : vector<1x128xi32>
    %299 = vector.broadcast %66 : f32 to vector<1x128xf32>
    %300 = arith.select %298, %299, %296 : vector<1x128xi1>, vector<1x128xf32>
    %c2_i32 = arith.constant 2 : i32
    %301 = vector.broadcast %c2_i32 : i32 to vector<1x128xi32>
    %302 = arith.cmpi eq, %291, %301 : vector<1x128xi32>
    %303 = vector.broadcast %215 : f32 to vector<1x128xf32>
    %304 = arith.select %302, %303, %300 : vector<1x128xi1>, vector<1x128xf32>
    %c3_i32 = arith.constant 3 : i32
    %305 = vector.broadcast %c3_i32 : i32 to vector<1x128xi32>
    %306 = arith.cmpi eq, %291, %305 : vector<1x128xi32>
    %307 = vector.broadcast %233 : f32 to vector<1x128xf32>
    %308 = arith.select %306, %307, %304 : vector<1x128xi1>, vector<1x128xf32>
    %c4_i32 = arith.constant 4 : i32
    %309 = vector.broadcast %c4_i32 : i32 to vector<1x128xi32>
    %310 = arith.cmpi eq, %291, %309 : vector<1x128xi32>
    %311 = vector.broadcast %256 : f32 to vector<1x128xf32>
    %312 = arith.select %310, %311, %308 : vector<1x128xi1>, vector<1x128xf32>
    %c5_i32 = arith.constant 5 : i32
    %313 = vector.broadcast %c5_i32 : i32 to vector<1x128xi32>
    %314 = arith.cmpi eq, %291, %313 : vector<1x128xi32>
    %315 = vector.broadcast %197 : f32 to vector<1x128xf32>
    %316 = arith.select %314, %315, %312 : vector<1x128xi1>, vector<1x128xf32>
    %c6_i32 = arith.constant 6 : i32
    %317 = vector.broadcast %c6_i32 : i32 to vector<1x128xi32>
    %318 = arith.cmpi eq, %291, %317 : vector<1x128xi32>
    %319 = vector.broadcast %275 : f32 to vector<1x128xf32>
    %320 = arith.select %318, %319, %316 : vector<1x128xi1>, vector<1x128xf32>
    %c7_i32 = arith.constant 7 : i32
    %321 = vector.broadcast %c7_i32 : i32 to vector<1x128xi32>
    %322 = arith.cmpi eq, %291, %321 : vector<1x128xi32>
    %323 = vector.broadcast %74 : f32 to vector<1x128xf32>
    %324 = arith.select %322, %323, %320 : vector<1x128xi1>, vector<1x128xf32>
    %c8_i32 = arith.constant 8 : i32
    %325 = vector.broadcast %c8_i32 : i32 to vector<1x128xi32>
    %326 = arith.cmpi eq, %291, %325 : vector<1x128xi32>
    %327 = vector.broadcast %290 : f32 to vector<1x128xf32>
    %328 = arith.select %326, %327, %324 : vector<1x128xi1>, vector<1x128xf32>
    %c0_98 = arith.constant 0 : index
    %c0_99 = arith.constant 0 : index
    %329 = vector.load %arg11[%c0_98, %c0_99] : memref<1x128xf32, #tpu.memory_space<vmem>>, vector<1x128xf32>
    tpu.vector_store %arg11[%c0_98, %c0_99], %328 {strides = array<i32>} : memref<1x128xf32, #tpu.memory_space<vmem>>, vector<1x128xf32>,
    return
  }
}

</mosaic_0001>

<bundles_post_ra>
// kernel: _advanced_loss.1
= control target key start
LH: loop header
LB: loop body
LE: loop exit
PB: predicated region body
PF: predicated region fallthrough
CT: control target
= control target key end

     0   :  { %16 = vsyncpa [#allocation5], 0  ;;  %s1844_s0 = inlined_call_operand.hbm [shape: f32[8,256], index: 0, kind: input, shape index: {}]   ;;  %s1845_s1 = inlined_call_operand.vmem [shape: f32[8,256], index: 1, kind: input, shape index: {}]   ;;  %s1846_s2 = inlined_call_operand.hbm [shape: f32[8,16], index: 2, kind: input, shape index: {}]   ;;  %s1847_s3 = inlined_call_operand.hbm [shape: f32[8,768], index: 3, kind: input, shape index: {}]   ;;  %s1848_s4 = inlined_call_operand.hbm [shape: f32[8,768], index: 4, kind: input, shape index: {}]   ;;  %s1849_s5 = inlined_call_operand.hbm [shape: f32[8,256], index: 5, kind: input, shape index: {}]   ;;  %s1850_s6 = inlined_call_operand.vmem [shape: f32[8,256], index: 6, kind: input, shape index: {}]   ;;  %s1851_s7 = inlined_call_operand.vmem [shape: s32[8,1], index: 7, kind: input, shape index: {}]   ;;  %s1852_s8 = inlined_call_operand.vmem [shape: f32[8,16], index: 8, kind: input, shape index: {}]   ;;  %s1853_s9 = inlined_call_operand.hbm [shape: bf16[768,512], index: 9, kind: input, shape index: {}]   ;;  %s1854_s10 = inlined_call_operand.vmem [shape: f32[1,512], index: 10, kind: input, shape index: {}]   ;;  %s1855_s11 = inlined_call_operand.vmem [shape: f32[1,128], index: 11, kind: output, shape index: {}]  }
   0x1   :  { %17 = vsyncpa [#allocation7], 0 }
   0x2   :  { %18 = vsyncpa [#allocation10], 0  ;;  %s1459_s17 = smov [#allocation6]   ;;  %s1460_s19 = smov [#allocation9]  }
   0x3   :  { %s37_s18 = sshll.u32 %s1459_s17, 4  ;;  %s57_s20 = sshll.u32 %s1460_s19, 4  ;;  %s38_s18 = int_to_ptr.vmem [resolvable:$true] %s37_s18  ;;  %s58_s20 = int_to_ptr.vmem [resolvable:$true] %s57_s20 }
   0x4   :  { %s1341_s23 = scalar_lea.hbm %s1846_s2, 128 }
   0x5   :  { %p1342_p0 = scmp.ne.s32.totalorder %s1846_s2, %s1341_s23  ;;  %p1345_p1 = scmp.lt.u32.totalorder %s1341_s23, %s1846_s2 }
   0x7   :  { %p1347_p2 = pnand %p1345_p1, %p1342_p0 }
   0x9   :  { %1350 = shalt.err (!%p1347_p2)
}
   0xa   :  { %s1351_s28 = scalar_lea.vmem %s38_s18, 128  ;;  %p1356_p4 = scmp.lt.s32.totalorder %s38_s18, %s38_s18 }
   0xb   :  { %p1352_p3 = scmp.ne.s32.totalorder %s38_s18, %s1351_s28  ;;  %p1357_p5 = scmp.lt.s32.totalorder %s1351_s28, %s1351_s28 }
   0xd   :  { %p1358_p6 = por %p1357_p5, %p1356_p4 }
   0xf   :  { %p1359_p7 = pnand %p1358_p6, %p1352_p3 }
  0x11   :  { %1362 = shalt.err (!%p1359_p7)
}
  0x12   :  { %40 = dma.hbm_to_vmem [thread:$0]  %s1846_s2, 128, %s38_s18, [#allocation7]  }
  0x13   :  { %s1363_s14 = scalar_lea.hbm %s1848_s4, 768 }
  0x14   :  { %p1364_p8 = scmp.ne.s32.totalorder %s1848_s4, %s1363_s14  ;;  %p1367_p9 = scmp.lt.u32.totalorder %s1363_s14, %s1848_s4 }
  0x16   :  { %p1369_p10 = pnand %p1367_p9, %p1364_p8 }
  0x18   :  { %1372 = shalt.err (!%p1369_p10)
}
  0x19   :  { %s1373_s21 = scalar_lea.vmem %s58_s20, 768  ;;  %p1378_p12 = scmp.lt.s32.totalorder %s58_s20, %s58_s20 }
  0x1a   :  { %p1374_p11 = scmp.ne.s32.totalorder %s58_s20, %s1373_s21  ;;  %p1379_p13 = scmp.lt.s32.totalorder %s1373_s21, %s1373_s21 }
  0x1c   :  { %p1380_p0 = por %p1379_p13, %p1378_p12 }
  0x1e   :  { %p1381_p1 = pnand %p1380_p0, %p1374_p11 }
  0x20   :  { %1384 = shalt.err (!%p1381_p1)
}
  0x21   :  { %60 = dma.hbm_to_vmem [thread:$0]  %s1848_s4, 768, %s58_s20, [#allocation10]  }
  0x22   :  { %s1461_s22 = smov [#allocation4]   ;;  %s1462_s24 = smov [#allocation8]  }
  0x23   :  { %s25_s23 = sshll.u32 %s1461_s22, 4  ;;  %s47_s25 = sshll.u32 %s1462_s24, 4  ;;  %s26_s23 = int_to_ptr.vmem [resolvable:$true] %s25_s23  ;;  %s48_s25 = int_to_ptr.vmem [resolvable:$true] %s47_s25 }
  0x24   :  { %s1385_s28 = scalar_lea.hbm %s1844_s0, 256 }
  0x25   :  { %p1386_p2 = scmp.ne.s32.totalorder %s1844_s0, %s1385_s28  ;;  %p1389_p3 = scmp.lt.u32.totalorder %s1385_s28, %s1844_s0 }
  0x27   :  { %p1391_p4 = pnand %p1389_p3, %p1386_p2 }
  0x29   :  { %1394 = shalt.err (!%p1391_p4)
}
  0x2a   :  { %s1395_s4 = scalar_lea.vmem %s26_s23, 256  ;;  %p1400_p6 = scmp.lt.s32.totalorder %s26_s23, %s26_s23 }
  0x2b   :  { %p1396_p5 = scmp.ne.s32.totalorder %s26_s23, %s1395_s4  ;;  %p1401_p7 = scmp.lt.s32.totalorder %s1395_s4, %s1395_s4 }
  0x2d   :  { %p1402_p8 = por %p1401_p7, %p1400_p6 }
  0x2f   :  { %p1403_p9 = pnand %p1402_p8, %p1396_p5 }
  0x31   :  { %1406 = shalt.err (!%p1403_p9)
}
  0x32   :  { %28 = dma.hbm_to_vmem [thread:$0]  %s1844_s0, 256, %s26_s23, [#allocation5]  }
  0x33   :  { %s1407_s17 = scalar_lea.hbm %s1847_s3, 768 }
  0x34   :  { %p1408_p10 = scmp.ne.s32.totalorder %s1847_s3, %s1407_s17  ;;  %p1411_p11 = scmp.lt.u32.totalorder %s1407_s17, %s1847_s3 }
  0x36   :  { %p1413_p12 = pnand %p1411_p11, %p1408_p10 }
  0x38   :  { %1416 = shalt.err (!%p1413_p12)
}
  0x39   :  { %s1417_s22 = scalar_lea.vmem %s48_s25, 768  ;;  %p1422_p0 = scmp.lt.s32.totalorder %s48_s25, %s48_s25 }
  0x3a   :  { %p1418_p13 = scmp.ne.s32.totalorder %s48_s25, %s1417_s22  ;;  %p1423_p1 = scmp.lt.s32.totalorder %s1417_s22, %s1417_s22 }
  0x3c   :  { %p1424_p2 = por %p1423_p1, %p1422_p0 }
  0x3e   :  { %p1425_p3 = pnand %p1424_p2, %p1418_p13 }
  0x40   :  { %1428 = shalt.err (!%p1425_p3)
}
  0x41   :  { %50 = dma.hbm_to_vmem [thread:$0]  %s1847_s3, 768, %s48_s25, [#allocation7]  }
  0x42   :  { %s1463_s24 = smov [#allocation11]   ;;  %s1429_s29 = scalar_lea.hbm %s1849_s5, 256 }
  0x43   :  { %s67_s26 = sshll.u32 %s1463_s24, 4  ;;  %p1430_p4 = scmp.ne.s32.totalorder %s1849_s5, %s1429_s29  ;;  %s68_s26 = int_to_ptr.vmem [resolvable:$true] %s67_s26 }
  0x44   :  { %p1433_p5 = scmp.lt.u32.totalorder %s1429_s29, %s1849_s5 }
  0x46   :  { %p1435_p6 = pnand %p1433_p5, %p1430_p4 }
  0x48   :  { %1438 = shalt.err (!%p1435_p6)
}
  0x49   :  { %s1439_s20 = scalar_lea.vmem %s68_s26, 256  ;;  %p1444_p8 = scmp.lt.s32.totalorder %s68_s26, %s68_s26 }
  0x4a   :  { %p1440_p7 = scmp.ne.s32.totalorder %s68_s26, %s1439_s20  ;;  %p1445_p9 = scmp.lt.s32.totalorder %s1439_s20, %s1439_s20 }
  0x4c   :  { %p1446_p10 = por %p1445_p9, %p1444_p8 }
  0x4e   :  { %p1447_p11 = pnand %p1446_p10, %p1440_p7 }
  0x50   :  { %1450 = shalt.err (!%p1447_p11)
}
  0x51   :  { %70 = dma.hbm_to_vmem [thread:$0]  %s1849_s5, 256, %s68_s26, [#allocation10]  }
  0x52   :  { %1451 = dma.done.wait [#allocation5], 256  }
  0x53   :  { %1452 = vsyncadd [#allocation5], 4294967040 }
  0x54   :  { %1453 = dma.done.wait [#allocation7], 896  }
  0x55   :  { %1454 = vsyncadd [#allocation7], 4294966400 }
  0x56   :  { %1455 = dma.done.wait [#allocation10], 1024  }
  0x57   :  { %1456 = vsyncadd [#allocation10], 4294966272  ;;  %s99_s14 = sld [smem:[#allocation0]]   ;;  %s1464_s15 = smov 512   ;;  %v1465_v0 = vmov 0   ;;  %vm273_vm0 = vcmask 1043456   ;;  %v140_v40 = vlaneseq }
  0x58   :  { %111 = sst [smem:[#allocation13]] %s1464_s15  ;;  %1296 = vset.pattern.permute.xlu0 %v1465_v0  ;;  %s1466_s16 = smov 4   ;;  %vm191_vm1 = vcmask 130048   ;;  %v1474_v43 = vmov 0.0   ;;  %vm208_vm4 = vcmask 7168  }
  0x59   :  { %113 = sst [smem:[#allocation13 + $0x1]] %s1464_s15  ;;  %s1467_s17 = smov 64   ;;  %v1626_v41 = vshrl.u32 %v140_v40, 7  ;;  %v1628_v42 = vand.u32 127, %v140_v40 }
  0x5a   :  { %115 = sst [smem:[#allocation13 + $0x2]] %s1466_s16  ;;  %s1468_s19 = smov 128  }
  0x5b   :  { %117 = sst [smem:[#allocation13 + $0x3]] %s1467_s17  ;;  %s1469_s21 = smov 2   ;;  %vm144_vm2 = vcmp.eq.s32.totalorder %v1626_v41, %v1628_v42 }
  0x5c   :  { %119 = sst [smem:[#allocation13 + $0x4]] %s1468_s19  ;;  %s1470_s2 = smov 256   ;;  %v1632_v44 = vsel %vm144_vm2, 1.0, %v1474_v43 }
  0x5d   :  { %121 = sst [smem:[#allocation13 + $0x5]] %s1469_s21  ;;  %s1224_s5 = sshll.u32 %s99_s14, 26 }
  0x5e   :  { %123 = sst [smem:[#allocation13 + $0x6]] %s1470_s2  ;;  %s1225_s18 = sadd.s32 134217728, %s1224_s5 }
  0x5f   :  { %125 = sst [smem:[#allocation13 + $0x7]] %s1467_s17  ;;  %s1471_s22 = smov [#allocation2]  }
  0x60   :  { %127 = sst [smem:[#allocation13 + $0x8]] %s1466_s16  ;;  %s107_s0 = sshll.u32 %s1471_s22, 4  ;;  %s108_s0 = int_to_ptr.vmem [resolvable:$true] %s107_s0 }
  0x61   :  { %s1472_s23 = smov [#allocation3]   ;;  %s1473_s24 = smov [#allocation12]  }
  0x62   :  { %129 = dma.general %s1853_s9, 24576, %s108_s0, %s1472_s23, %s1473_s24, [#allocation13], %s1225_s18, 0  }
  0x63   :  { %v237_v1 = vld [vmem:[#allocation8] sm:$0xff]  ;;  %v238_v2 = vld [vmem:[#allocation8 + $0x8] sm:$0xff]  ;;  %v239_v3 = vld [vmem:[#allocation8 + $0x10] sm:$0xff] }
  0x64   :  { %v240_v4 = vld [vmem:[#allocation8 + $0x18] sm:$0xff]  ;;  %v241_v5 = vld [vmem:[#allocation8 + $0x20] sm:$0xff]  ;;  %v242_v6 = vld [vmem:[#allocation8 + $0x28] sm:$0xff]  ;;  %v243_v7 = vpack.c.bf16 %v237_v1, %v237_v1  ;;  %v244_v8 = vpack.c.bf16 %v238_v2, %v238_v2  ;;  %v245_v9 = vpack.c.bf16 %v239_v3, %v239_v3 }
  0x65   :  { %v246_v10 = vpack.c.bf16 %v240_v4, %v240_v4  ;;  %v249_v11 = vld [vmem:[#allocation9] sm:$0xff]  ;;  %v250_v12 = vld [vmem:[#allocation9 + $0x8] sm:$0xff]  ;;  %v251_v13 = vld [vmem:[#allocation9 + $0x10] sm:$0xff]  ;;  %v247_v14 = vpack.c.bf16 %v241_v5, %v241_v5  ;;  %v248_v21 = vpack.c.bf16 %v242_v6, %v242_v6 }
  0x66   :  { %v252_v15 = vld [vmem:[#allocation9 + $0x18] sm:$0xff]  ;;  %v253_v16 = vld [vmem:[#allocation9 + $0x20] sm:$0xff]  ;;  %v254_v17 = vld [vmem:[#allocation9 + $0x28] sm:$0xff]  ;;  %v255_v18 = vpack.c.bf16 %v249_v11, %v249_v11  ;;  %v256_v19 = vpack.c.bf16 %v250_v12, %v250_v12  ;;  %v257_v20 = vpack.c.bf16 %v251_v13, %v251_v13 }
  0x67   :  { %v258_v22 = vpack.c.bf16 %v252_v15, %v252_v15  ;;  %v259_v23 = vpack.c.bf16 %v253_v16, %v253_v16  ;;  %v260_v24 = vpack.c.bf16 %v254_v17, %v254_v17  ;;  %v134_v25 = vld [vmem:[#allocation6] sm:$0xff]  ;;  %v183_v39 = vld [vmem:[%s1851_s7] sm:$0xff]  ;;  %v131_v0 = vld [vmem:[#allocation4 + $0x8] sm:$0xff] }
  0x68   :  { %v267_v26 = vrot.slane %v255_v18, 4  ;;  %v268_v27 = vrot.slane %v256_v19, 4  ;;  %v269_v28 = vrot.slane %v257_v20, 4  ;;  %v195_v29 = vsel %vm191_vm1, %v134_v25, -inf  ;;  %v139_v55 = vld [vmem:[%s1852_s8] sm:$0xff]  ;;  %v138_v6 = vld [vmem:[%s1850_s6 + $0x8] sm:$0xff] }
  0x69   :  { %v270_v30 = vrot.slane %v258_v22, 4  ;;  %v271_v31 = vrot.slane %v259_v23, 4  ;;  %v272_v32 = vrot.slane %v260_v24, 4  ;;  %196 = vmax.xlane.f32.xlu0 %v195_v29  ;;  %v1228_v58 = vadd.f32 -0.5, %v139_v55  ;;  %v130_v63 = vld [vmem:[#allocation4] sm:$0xff]  ;;  %v133_v11 = vld [vmem:[%s1845_s1 + $0x8] sm:$0xff] }
  0x6a   :  { %v1606_v33 = vsel %vm273_vm0, %v243_v7, %v267_v26  ;;  %v1609_v34 = vsel %vm273_vm0, %v244_v8, %v268_v27  ;;  %v1612_v35 = vsel %vm273_vm0, %v245_v9, %v269_v28  ;;  %v147_v2 = vmul.f32 %v130_v63, %v130_v63  ;;  %v137_v5 = vld [vmem:[%s1850_s6] sm:$0xff]  ;;  %v135_v15 = vld [vmem:[#allocation11] sm:$0xff] }
  0x6b   :  { %v1615_v36 = vsel %vm273_vm0, %v246_v10, %v270_v30  ;;  %v1618_v37 = vsel %vm273_vm0, %v247_v14, %v271_v31  ;;  %v1621_v38 = vsel %vm273_vm0, %v248_v21, %v272_v32  ;;  %v223_v62 = vmul.f32 %v1228_v58, %v1228_v58  ;;  %v132_v10 = vld [vmem:[%s1845_s1] sm:$0xff] }
  0x6c   :  { %v148_v3 = vmul.f32 %v131_v0, %v131_v0  ;;  %v156_v8 = vmul.f32 %v137_v5, %v137_v5  ;;  %v157_v9 = vmul.f32 %v138_v6, %v138_v6  ;;  %v165_v13 = vmul.f32 %v132_v10, %v132_v10  ;;  %v136_v16 = vld [vmem:[#allocation11 + $0x8] sm:$0xff] }
  0x6d   :  { %v224_v4 = vsel %vm191_vm1, %v223_v62, 0.0  ;;  %v166_v14 = vmul.f32 %v133_v11, %v133_v11  ;;  %v174_v18 = vmul.f32 %v135_v15, %v135_v15  ;;  %v175_v19 = vmul.f32 %v136_v16, %v136_v16 }
  0x6e   :  { %v149_v7 = vadd.f32 %v148_v3, %v147_v2  ;;  %v158_v12 = vadd.f32 %v157_v9, %v156_v8 }
  0x6f   :  { %v167_v17 = vadd.f32 %v166_v14, %v165_v13  ;;  %v176_v20 = vadd.f32 %v175_v19, %v174_v18 }
  0x7f   :  { %185 = vperm.xlu0 %1296, %v183_v39  }
  0xf6   :  { %v197_v45 = vpop.xlane.xlu0 %196 }
  0xf7   :  { %v198_v46 = vsub.f32 %v134_v25, %v197_v45 }
  0xf9   :  { %v199_v47 = vmul.f32 1.442695, %v198_v46 }
  0xfb   :  { %1297 = vpow2.f32 %v199_v47 }
  0xfe   :  { %v186_v48 = vpop.permute.xlu0 %185 }
  0xff   :  { %vm187_vm3 = vcmp.eq.s32.totalorder %v1628_v42, %v186_v48 }
 0x100   :  { %v1227_v49 = vsel %vm187_vm3, 1.0, %v1474_v43 }
 0x101   :  { %v190_v50 = vmul.f32 %v1227_v49, %v134_v25 }
 0x103   :  { %v192_v53 = vsel %vm191_vm1, %v190_v50, 0.0 }
 0x105   :  { %v1298_v51 = vpop.eup %1297 }
 0x106   :  { %v201_v52 = vsel %vm191_vm1, %v1298_v51, 0.0 }
 0x107   :  { %202 = vadd.xlane.f32.xlu1 %v201_v52 }
 0x10b   :  { %193 = vadd.xlane.f32.xlu1 %v192_v53 }
 0x194   :  { %v203_v54 = vpop.xlane.xlu1 %202 }
 0x195   :  { %1299 = vlog2.f32 %v203_v54 }
 0x198   :  { %v194_v59 = vpop.xlane.xlu1 %193 }
 0x19f   :  { %v1300_v56 = vpop.eup %1299 }
 0x1a0   :  { %v205_v57 = vmul.f32 0.6931472, %v1300_v56 }
 0x1a2   :  { %v206_v60 = vadd.f32 %v205_v57, %v197_v45 }
 0x1a4   :  { %v207_v61 = vsub.f32 %v206_v60, %v194_v59 }
 0x1a6   :  { %v209_v1 = vsel %vm208_vm4, %v207_v61, 0.0 }
 0x1a7   :  { %210 = vadd.xlane.f32.xlu1 %v209_v1 }
 0x1ab   :  { %225 = vadd.xlane.f32.xlu1 %v224_v4 }
 0x1af   :  { %150 = vadd.xlane.f32.xlu1 %v149_v7 }
 0x1b3   :  { %159 = vadd.xlane.f32.xlu1 %v158_v12 }
 0x1b7   :  { %168 = vadd.xlane.f32.xlu1 %v167_v17 }
 0x1bb   :  { %177 = vadd.xlane.f32.xlu1 %v176_v20 }
 0x234   :  { %v211_v21 = vpop.xlane.xlu1 %210 }
 0x235   :  { %v212_v22 = vrot.slane %v211_v21, 4 }
 0x237   :  { %v213_v23 = vadd.f32 %v212_v22, %v211_v21 }
 0x238   :  { %v226_v24 = vpop.xlane.xlu1 %225 }
 0x239   :  { %v214_v25 = vrot.slane %v213_v23, 2  ;;  %v227_v26 = vrot.slane %v226_v24, 4 }
 0x23b   :  { %v228_v27 = vadd.f32 %v227_v26, %v226_v24  ;;  %v215_v28 = vadd.f32 %v214_v25, %v213_v23 }
 0x23c   :  { %v151_v29 = vpop.xlane.xlu1 %150 }
 0x23d   :  { %v229_v30 = vrot.slane %v228_v27, 2  ;;  %v216_v31 = vrot.slane %v215_v28, 1  ;;  %v152_v32 = vmax.f32 %v151_v29, 1e-24 }
 0x23f   :  { %v217_v39 = vadd.f32 %v216_v31, %v215_v28  ;;  %v230_v40 = vadd.f32 %v229_v30, %v228_v27  ;;  %1301 = vrsqrt.f32 %v152_v32 }
 0x240   :  { %v160_v43 = vpop.xlane.xlu1 %159 }
 0x241   :  { %1254 = vpush %v217_v39  ;;  %v231_v45 = vrot.slane %v230_v40, 1  ;;  %v161_v46 = vmax.f32 %v160_v43, 1e-24 }
 0x243   :  { %v232_v47 = vadd.f32 %v231_v45, %v230_v40  ;;  %1303 = vrsqrt.f32 %v161_v46 }
 0x244   :  { %v169_v48 = vpop.xlane.xlu1 %168 }
 0x245   :  { %1256 = vpush %v232_v47  ;;  %v170_v49 = vmax.f32 %v169_v48, 1e-24 }
 0x247   :  { %1305 = vrsqrt.f32 %v170_v49 }
 0x248   :  { %v178_v50 = vpop.xlane.xlu1 %177 }
 0x249   :  { %v1302_v51 = vpop.eup %1301  ;;  %v179_v52 = vmax.f32 %v178_v50, 1e-24 }
 0x24a   :  { %v1654_v53 = vmul.f32 %v1302_v51, %v130_v63  ;;  %v1656_v54 = vmul.f32 %v1302_v51, %v131_v0 }
 0x24b   :  { %1307 = vrsqrt.f32 %v179_v52 }
 0x24d   :  { %v1304_v55 = vpop.eup %1303 }
 0x24e   :  { %v1658_v56 = vmul.f32 %v1304_v55, %v137_v5  ;;  %v1660_v57 = vmul.f32 %v1304_v55, %v138_v6 }
 0x251   :  { %v1306_v58 = vpop.eup %1305 }
 0x252   :  { %v1662_v59 = vmul.f32 %v1306_v58, %v132_v10  ;;  %v1664_v60 = vmul.f32 %v1306_v58, %v133_v11 }
 0x255   :  { %v1308_v61 = vpop.eup %1307 }
 0x256   :  { %v1666_v62 = vmul.f32 %v1308_v61, %v135_v15  ;;  %v1668_v1 = vmul.f32 %v1308_v61, %v136_v16 }
 0x272   :  { %s1670_s1 = spop %1254 }
 0x273   :  { %s221_s6 = smul.f32 0.125, %s1670_s1 }
 0x276   :  { %s1673_s14 = spop %1256 }
 0x277   :  { %s236_s15 = smul.f32 0.0078125, %s1673_s14 }
 0x278   :  { %1457 = dma.done.wait [#allocation3], 24576 }
 0x279   :  { %1458 = vsyncadd [#allocation3], 4294942720  ;;  %548 = vmatprep.mubr.bf16.mxu0 %v1609_v34  ;;  %671 = vmatprep.mubr.bf16.mxu1 %v1609_v34  ;;  %v303_v63 = vld [vmem:[#allocation2 + $0x8] sm:$0xff]  ;;  %v305_v0 = vld [vmem:[#allocation2 + $0x18] sm:$0xff]  ;;  %s1476_s19 = smov 120   ;;  %s1477_s21 = smov 24  }
 0x27a   :  { %v302_v2 = vld [vmem:[#allocation2] sm:$0xff]  ;;  %516 = vmatprep.subr.bf16.mxu0 %v303_v63  ;;  %639 = vmatprep.subr.bf16.mxu1 %v305_v0  ;;  %v304_v3 = vld [vmem:[#allocation2 + $0x10] sm:$0xff]  ;;  %v307_v4 = vld [vmem:[#allocation2 + $0x28] sm:$0xff]  ;;  %s1478_s5 = smov 16   ;;  %vm842_vm5 = vcmask 64512   ;;  %s1479_s2 = smov 104  }
 0x27b   :  { %v309_v5 = vld [vmem:[#allocation2 + $0x38] sm:$0xff]  ;;  %517 = vmatpush1.bf16.msra.mxu0 %v302_v2  ;;  %640 = vmatpush1.bf16.msra.mxu1 %v304_v3  ;;  %v306_v6 = vld [vmem:[#allocation2 + $0x20] sm:$0xff]  ;;  %v308_v7 = vld [vmem:[#allocation2 + $0x30] sm:$0xff]  ;;  %s1480_s18 = smov 112   ;;  %vm926_vm6 = vcmask 130112   ;;  %vm898_vm7 = vcmask 57344  }
 0x27c   :  { %518 = vmatprep.subr.bf16.mxu0 %v307_v4  ;;  %641 = vmatprep.subr.bf16.mxu1 %v309_v5  ;;  %v311_v8 = vld [vmem:[#allocation2 + $0x48] sm:$0xff]  ;;  %v313_v9 = vld [vmem:[#allocation2 + $0x58] sm:$0xff]  ;;  %v310_v34 = vld [vmem:[#allocation2 + $0x40] sm:$0xff]  ;;  %vm1183_vm8 = vcmp.eq.s32.totalorder %v1628_v42, 0  ;;  %vm1186_vm9 = vcmp.eq.s32.totalorder %v1628_v42, 1  ;;  %vm1189_vm10 = vcmp.eq.s32.totalorder %v1628_v42, 2 }
 0x27d   :  { %v312_v10 = vld [vmem:[#allocation2 + $0x50] sm:$0xff]  ;;  %v315_v11 = vld [vmem:[#allocation2 + $0x68] sm:$0xff]  ;;  %v317_v12 = vld [vmem:[#allocation2 + $0x78] sm:$0xff]  ;;  %vm1192_vm11 = vcmp.eq.s32.totalorder %v1628_v42, 3  ;;  %vm1195_vm12 = vcmp.eq.s32.totalorder %v1628_v42, 4  ;;  %vm1198_vm13 = vcmp.eq.s32.totalorder %v1628_v42, 5 }
 0x27e   :  { %v314_v13 = vld [vmem:[#allocation2 + $0x60] sm:$0xff]  ;;  %v316_v14 = vld [vmem:[#allocation2 + $0x70] sm:$0xff]  ;;  %v319_v15 = vld [vmem:[#allocation2 + $0x88] sm:$0xff]  ;;  %vm1201_vm14 = vcmp.eq.s32.totalorder %v1628_v42, 6  ;;  %vm1204_vm15 = vcmp.eq.s32.totalorder %v1628_v42, 7  ;;  %vm1207_vm0 = vcmp.eq.s32.totalorder %v1628_v42, 8 }
 0x27f   :  { %519 = vmatpush1.bf16.msra.mxu0 %v306_v6  ;;  %642 = vmatpush1.bf16.msra.mxu1 %v308_v7  ;;  %v321_v16 = vld [vmem:[#allocation2 + $0x98] sm:$0xff]  ;;  %v318_v17 = vld [vmem:[#allocation2 + $0x80] sm:$0xff]  ;;  %v320_v18 = vld [vmem:[#allocation2 + $0x90] sm:$0xff] }
 0x280   :  { %520 = vmatprep.subr.bf16.mxu0 %v311_v8  ;;  %643 = vmatprep.subr.bf16.mxu1 %v313_v9  ;;  %v323_v19 = vld [vmem:[#allocation2 + $0xa8] sm:$0xff]  ;;  %v325_v20 = vld [vmem:[#allocation2 + $0xb8] sm:$0xff]  ;;  %v322_v21 = vld [vmem:[#allocation2 + $0xa0] sm:$0xff] }
 0x281   :  { %v324_v22 = vld [vmem:[#allocation2 + $0xb0] sm:$0xff]  ;;  %v327_v23 = vld [vmem:[#allocation2 + $0xc8] sm:$0xff]  ;;  %v329_v24 = vld [vmem:[#allocation2 + $0xd8] sm:$0xff] }
 0x282   :  { %v326_v25 = vld [vmem:[#allocation2 + $0xc0] sm:$0xff]  ;;  %v328_v26 = vld [vmem:[#allocation2 + $0xd0] sm:$0xff]  ;;  %v331_v27 = vld [vmem:[#allocation2 + $0xe8] sm:$0xff] }
 0x283   :  { %521 = vmatpush1.bf16.msra.mxu0 %v310_v34  ;;  %644 = vmatpush1.bf16.msra.mxu1 %v312_v10  ;;  %v333_v28 = vld [vmem:[#allocation2 + $0xf8] sm:$0xff]  ;;  %v330_v29 = vld [vmem:[#allocation2 + $0xe0] sm:$0xff]  ;;  %v332_v30 = vld [vmem:[#allocation2 + $0xf0] sm:$0xff] }
 0x284   :  { %522 = vmatprep.subr.bf16.mxu0 %v315_v11  ;;  %645 = vmatprep.subr.bf16.mxu1 %v317_v12  ;;  %v335_v31 = vld [vmem:[#allocation2 + $0x108] sm:$0xff]  ;;  %v337_v32 = vld [vmem:[#allocation2 + $0x118] sm:$0xff]  ;;  %v334_v39 = vld [vmem:[#allocation2 + $0x100] sm:$0xff] }
 0x285   :  { %v336_v40 = vld [vmem:[#allocation2 + $0x110] sm:$0xff]  ;;  %v339_v43 = vld [vmem:[#allocation2 + $0x128] sm:$0xff]  ;;  %v341_v45 = vld [vmem:[#allocation2 + $0x138] sm:$0xff] }
 0x286   :  { %v338_v46 = vld [vmem:[#allocation2 + $0x120] sm:$0xff]  ;;  %v340_v47 = vld [vmem:[#allocation2 + $0x130] sm:$0xff]  ;;  %v343_v48 = vld [vmem:[#allocation2 + $0x148] sm:$0xff] }
 0x287   :  { %523 = vmatpush1.bf16.msra.mxu0 %v314_v13  ;;  %646 = vmatpush1.bf16.msra.mxu1 %v316_v14  ;;  %v345_v49 = vld [vmem:[#allocation2 + $0x158] sm:$0xff]  ;;  %v342_v50 = vld [vmem:[#allocation2 + $0x140] sm:$0xff]  ;;  %v344_v51 = vld [vmem:[#allocation2 + $0x150] sm:$0xff] }
 0x288   :  { %524 = vmatprep.subr.bf16.mxu0 %v319_v15  ;;  %647 = vmatprep.subr.bf16.mxu1 %v321_v16  ;;  %v347_v52 = vld [vmem:[#allocation2 + $0x168] sm:$0xff]  ;;  %v349_v55 = vld [vmem:[#allocation2 + $0x178] sm:$0xff]  ;;  %v346_v58 = vld [vmem:[#allocation2 + $0x160] sm:$0xff] }
 0x289   :  { %v348_v61 = vld [vmem:[#allocation2 + $0x170] sm:$0xff]  ;;  %v351_v63 = vld [vmem:[#allocation2 + $0x188] sm:$0xff]  ;;  %v353_v0 = vld [vmem:[#allocation2 + $0x198] sm:$0xff] }
 0x28a   :  { %v350_v2 = vld [vmem:[#allocation2 + $0x180] sm:$0xff]  ;;  %v352_v3 = vld [vmem:[#allocation2 + $0x190] sm:$0xff]  ;;  %v355_v4 = vld [vmem:[#allocation2 + $0x1a8] sm:$0xff] }
 0x28b   :  { %525 = vmatpush1.bf16.msra.mxu0 %v318_v17  ;;  %648 = vmatpush1.bf16.msra.mxu1 %v320_v18  ;;  %v357_v5 = vld [vmem:[#allocation2 + $0x1b8] sm:$0xff]  ;;  %v354_v6 = vld [vmem:[#allocation2 + $0x1a0] sm:$0xff]  ;;  %v356_v7 = vld [vmem:[#allocation2 + $0x1b0] sm:$0xff] }
 0x28c   :  { %526 = vmatprep.subr.bf16.mxu0 %v323_v19  ;;  %649 = vmatprep.subr.bf16.mxu1 %v325_v20  ;;  %v359_v8 = vld [vmem:[#allocation2 + $0x1c8] sm:$0xff]  ;;  %v361_v9 = vld [vmem:[#allocation2 + $0x1d8] sm:$0xff]  ;;  %v358_v34 = vld [vmem:[#allocation2 + $0x1c0] sm:$0xff] }
 0x28d   :  { %v360_v10 = vld [vmem:[#allocation2 + $0x1d0] sm:$0xff]  ;;  %v363_v11 = vld [vmem:[#allocation2 + $0x1e8] sm:$0xff]  ;;  %v365_v12 = vld [vmem:[#allocation2 + $0x1f8] sm:$0xff] }
 0x28e   :  { %v362_v13 = vld [vmem:[#allocation2 + $0x1e0] sm:$0xff]  ;;  %v364_v14 = vld [vmem:[#allocation2 + $0x1f0] sm:$0xff]  ;;  %v367_v15 = vld [vmem:[#allocation2 + $0x208] sm:$0xff] }
 0x28f   :  { %527 = vmatpush1.bf16.msra.mxu0 %v322_v21  ;;  %650 = vmatpush1.bf16.msra.mxu1 %v324_v22  ;;  %v369_v16 = vld [vmem:[#allocation2 + $0x218] sm:$0xff]  ;;  %v366_v17 = vld [vmem:[#allocation2 + $0x200] sm:$0xff]  ;;  %v368_v18 = vld [vmem:[#allocation2 + $0x210] sm:$0xff] }
 0x290   :  { %528 = vmatprep.subr.bf16.mxu0 %v327_v23  ;;  %651 = vmatprep.subr.bf16.mxu1 %v329_v24  ;;  %v371_v19 = vld [vmem:[#allocation2 + $0x228] sm:$0xff]  ;;  %v373_v20 = vld [vmem:[#allocation2 + $0x238] sm:$0xff]  ;;  %v370_v21 = vld [vmem:[#allocation2 + $0x220] sm:$0xff] }
 0x291   :  { %v372_v22 = vld [vmem:[#allocation2 + $0x230] sm:$0xff]  ;;  %v375_v23 = vld [vmem:[#allocation2 + $0x248] sm:$0xff]  ;;  %v377_v24 = vld [vmem:[#allocation2 + $0x258] sm:$0xff] }
 0x293   :  { %529 = vmatpush1.bf16.msra.mxu0 %v326_v25  ;;  %652 = vmatpush1.bf16.msra.mxu1 %v328_v26  ;;  %v374_v25 = vld [vmem:[#allocation2 + $0x240] sm:$0xff]  ;;  %v376_v26 = vld [vmem:[#allocation2 + $0x250] sm:$0xff] }
 0x294   :  { %530 = vmatprep.subr.bf16.mxu0 %v331_v27  ;;  %653 = vmatprep.subr.bf16.mxu1 %v333_v28  ;;  %v379_v27 = vld [vmem:[#allocation2 + $0x268] sm:$0xff]  ;;  %v378_v28 = vld [vmem:[#allocation2 + $0x260] sm:$0xff] }
 0x297   :  { %531 = vmatpush1.bf16.msra.mxu0 %v330_v29  ;;  %654 = vmatpush1.bf16.msra.mxu1 %v332_v30  ;;  %v380_v29 = vld [vmem:[#allocation2 + $0x270] sm:$0xff]  ;;  %v383_v30 = vld [vmem:[#allocation2 + $0x288] sm:$0xff] }
 0x298   :  { %532 = vmatprep.subr.bf16.mxu0 %v335_v31  ;;  %655 = vmatprep.subr.bf16.mxu1 %v337_v32  ;;  %v385_v31 = vld [vmem:[#allocation2 + $0x298] sm:$0xff]  ;;  %v384_v32 = vld [vmem:[#allocation2 + $0x290] sm:$0xff] }
 0x29b   :  { %533 = vmatpush1.bf16.msra.mxu0 %v334_v39  ;;  %656 = vmatpush1.bf16.msra.mxu1 %v336_v40  ;;  %v387_v39 = vld [vmem:[#allocation2 + $0x2a8] sm:$0xff]  ;;  %v389_v40 = vld [vmem:[#allocation2 + $0x2b8] sm:$0xff] }
 0x29c   :  { %534 = vmatprep.subr.bf16.mxu0 %v339_v43  ;;  %657 = vmatprep.subr.bf16.mxu1 %v341_v45  ;;  %v386_v43 = vld [vmem:[#allocation2 + $0x2a0] sm:$0xff]  ;;  %v388_v45 = vld [vmem:[#allocation2 + $0x2b0] sm:$0xff] }
 0x29f   :  { %535 = vmatpush1.bf16.msra.mxu0 %v338_v46  ;;  %658 = vmatpush1.bf16.msra.mxu1 %v340_v47  ;;  %v391_v46 = vld [vmem:[#allocation2 + $0x2c8] sm:$0xff]  ;;  %v393_v47 = vld [vmem:[#allocation2 + $0x2d8] sm:$0xff] }
 0x2a0   :  { %536 = vmatprep.subr.bf16.mxu0 %v343_v48  ;;  %659 = vmatprep.subr.bf16.mxu1 %v345_v49  ;;  %v390_v48 = vld [vmem:[#allocation2 + $0x2c0] sm:$0xff]  ;;  %v392_v49 = vld [vmem:[#allocation2 + $0x2d0] sm:$0xff] }
 0x2a3   :  { %537 = vmatpush1.bf16.msra.mxu0 %v342_v50  ;;  %660 = vmatpush1.bf16.msra.mxu1 %v344_v51  ;;  %v395_v50 = vld [vmem:[#allocation2 + $0x2e8] sm:$0xff]  ;;  %v397_v51 = vld [vmem:[#allocation2 + $0x2f8] sm:$0xff] }
 0x2a4   :  { %538 = vmatprep.subr.bf16.mxu0 %v347_v52  ;;  %661 = vmatprep.subr.bf16.mxu1 %v349_v55  ;;  %v394_v52 = vld [vmem:[#allocation2 + $0x2e0] sm:$0xff]  ;;  %v396_v55 = vld [vmem:[#allocation2 + $0x2f0] sm:$0xff] }
 0x2a7   :  { %539 = vmatpush1.bf16.msra.mxu0 %v346_v58  ;;  %662 = vmatpush1.bf16.msra.mxu1 %v348_v61  ;;  %v399_v58 = vld [vmem:[#allocation2 + $0x308] sm:$0xff]  ;;  %v401_v61 = vld [vmem:[#allocation2 + $0x318] sm:$0xff] }
 0x2a8   :  { %540 = vmatprep.subr.bf16.mxu0 %v351_v63  ;;  %663 = vmatprep.subr.bf16.mxu1 %v353_v0  ;;  %v398_v63 = vld [vmem:[#allocation2 + $0x300] sm:$0xff]  ;;  %v400_v0 = vld [vmem:[#allocation2 + $0x310] sm:$0xff] }
 0x2ab   :  { %541 = vmatpush1.bf16.msra.mxu0 %v350_v2  ;;  %664 = vmatpush1.bf16.msra.mxu1 %v352_v3  ;;  %v403_v2 = vld [vmem:[#allocation2 + $0x328] sm:$0xff]  ;;  %v405_v3 = vld [vmem:[#allocation2 + $0x338] sm:$0xff] }
 0x2ac   :  { %542 = vmatprep.subr.bf16.mxu0 %v355_v4  ;;  %665 = vmatprep.subr.bf16.mxu1 %v357_v5  ;;  %v402_v4 = vld [vmem:[#allocation2 + $0x320] sm:$0xff]  ;;  %v404_v5 = vld [vmem:[#allocation2 + $0x330] sm:$0xff] }
 0x2af   :  { %543 = vmatpush1.bf16.msra.mxu0 %v354_v6  ;;  %666 = vmatpush1.bf16.msra.mxu1 %v356_v7  ;;  %v407_v6 = vld [vmem:[#allocation2 + $0x348] sm:$0xff]  ;;  %v409_v7 = vld [vmem:[#allocation2 + $0x358] sm:$0xff] }
 0x2b0   :  { %544 = vmatprep.subr.bf16.mxu0 %v359_v8  ;;  %667 = vmatprep.subr.bf16.mxu1 %v361_v9  ;;  %v406_v8 = vld [vmem:[#allocation2 + $0x340] sm:$0xff]  ;;  %v408_v9 = vld [vmem:[#allocation2 + $0x350] sm:$0xff] }
 0x2b3   :  { %545 = vmatpush1.bf16.msra.mxu0 %v358_v34  ;;  %668 = vmatpush1.bf16.msra.mxu1 %v360_v10  ;;  %v411_v34 = vld [vmem:[#allocation2 + $0x368] sm:$0xff]  ;;  %v413_v10 = vld [vmem:[#allocation2 + $0x378] sm:$0xff] }
 0x2b4   :  { %546 = vmatprep.subr.bf16.mxu0 %v363_v11  ;;  %669 = vmatprep.subr.bf16.mxu1 %v365_v12  ;;  %v410_v11 = vld [vmem:[#allocation2 + $0x360] sm:$0xff]  ;;  %v412_v12 = vld [vmem:[#allocation2 + $0x370] sm:$0xff] }
 0x2b7   :  { %547 = vmatpush1.bf16.msra.mxu0 %v362_v13  ;;  %670 = vmatpush1.bf16.msra.mxu1 %v364_v14  ;;  %v415_v13 = vld [vmem:[#allocation2 + $0x388] sm:$0xff]  ;;  %v417_v14 = vld [vmem:[#allocation2 + $0x398] sm:$0xff] }
 0x2b8   :  { %557 = vmatprep.subr.bf16.mxu0 %v367_v15  ;;  %680 = vmatprep.subr.bf16.mxu1 %v369_v16  ;;  %v414_v15 = vld [vmem:[#allocation2 + $0x380] sm:$0xff]  ;;  %v416_v16 = vld [vmem:[#allocation2 + $0x390] sm:$0xff] }
 0x2ba   :  { %549 = vmatmul.mubr.bf16.vlgmr.msra.gmra.mrb[0].mxu0 %v1606_v33  ;;  %672 = vmatmul.mubr.bf16.vlgmr.msra.gmra.mrb[0].mxu1 %v1606_v33  ;;  %v381_v33 = vld [vmem:[#allocation2 + $0x278] sm:$0xff] }
 0x2bb   :  { %558 = vmatpush1.bf16.msra.mxu0 %v366_v17  ;;  %681 = vmatpush1.bf16.msra.mxu1 %v368_v18  ;;  %v419_v17 = vld [vmem:[#allocation2 + $0x3a8] sm:$0xff]  ;;  %v421_v18 = vld [vmem:[#allocation2 + $0x3b8] sm:$0xff] }
 0x2bc   :  { %559 = vmatprep.subr.bf16.mxu0 %v371_v19  ;;  %682 = vmatprep.subr.bf16.mxu1 %v373_v20  ;;  %v418_v19 = vld [vmem:[#allocation2 + $0x3a0] sm:$0xff]  ;;  %v420_v20 = vld [vmem:[#allocation2 + $0x3b0] sm:$0xff] }
 0x2bd   :  { %589 = vmatprep.mubr.bf16.mxu0 %v1615_v36  ;;  %712 = vmatprep.mubr.bf16.mxu1 %v1615_v36  ;;  %v382_v36 = vld [vmem:[#allocation2 + $0x280] sm:$0xff] }
 0x2bf   :  { %560 = vmatpush1.bf16.msra.mxu0 %v370_v21  ;;  %683 = vmatpush1.bf16.msra.mxu1 %v372_v22  ;;  %v423_v21 = vld [vmem:[#allocation2 + $0x3c8] sm:$0xff]  ;;  %v425_v22 = vld [vmem:[#allocation2 + $0x3d8] sm:$0xff] }
 0x2c0   :  { %561 = vmatprep.subr.bf16.mxu0 %v375_v23  ;;  %684 = vmatprep.subr.bf16.mxu1 %v377_v24  ;;  %v422_v23 = vld [vmem:[#allocation2 + $0x3c0] sm:$0xff]  ;;  %v424_v24 = vld [vmem:[#allocation2 + $0x3d0] sm:$0xff] }
 0x2c3   :  { %562 = vmatpush1.bf16.msra.mxu0 %v374_v25  ;;  %685 = vmatpush1.bf16.msra.mxu1 %v376_v26  ;;  %v427_v25 = vld [vmem:[#allocation2 + $0x3e8] sm:$0xff]  ;;  %v429_v26 = vld [vmem:[#allocation2 + $0x3f8] sm:$0xff] }
 0x2c4   :  { %563 = vmatprep.subr.bf16.mxu0 %v379_v27  ;;  %686 = vmatprep.subr.bf16.mxu1 %v381_v33  ;;  %v426_v27 = vld [vmem:[#allocation2 + $0x3e0] sm:$0xff]  ;;  %v428_v33 = vld [vmem:[#allocation2 + $0x3f0] sm:$0xff] }
 0x2c7   :  { %564 = vmatpush1.bf16.msra.mxu0 %v378_v28  ;;  %687 = vmatpush1.bf16.msra.mxu1 %v380_v29  ;;  %v431_v28 = vld [vmem:[#allocation2 + $0x408] sm:$0xff]  ;;  %v433_v29 = vld [vmem:[#allocation2 + $0x418] sm:$0xff] }
 0x2c8   :  { %565 = vmatprep.subr.bf16.mxu0 %v383_v30  ;;  %688 = vmatprep.subr.bf16.mxu1 %v385_v31  ;;  %v430_v30 = vld [vmem:[#allocation2 + $0x400] sm:$0xff]  ;;  %v432_v31 = vld [vmem:[#allocation2 + $0x410] sm:$0xff] }
 0x2cb   :  { %566 = vmatpush1.bf16.msra.mxu0 %v382_v36  ;;  %689 = vmatpush1.bf16.msra.mxu1 %v384_v32  ;;  %v435_v36 = vld [vmem:[#allocation2 + $0x428] sm:$0xff]  ;;  %v437_v32 = vld [vmem:[#allocation2 + $0x438] sm:$0xff] }
 0x2cc   :  { %567 = vmatprep.subr.bf16.mxu0 %v387_v39  ;;  %690 = vmatprep.subr.bf16.mxu1 %v389_v40  ;;  %v434_v39 = vld [vmem:[#allocation2 + $0x420] sm:$0xff]  ;;  %v436_v40 = vld [vmem:[#allocation2 + $0x430] sm:$0xff] }
 0x2cf   :  { %568 = vmatpush1.bf16.msra.mxu0 %v386_v43  ;;  %691 = vmatpush1.bf16.msra.mxu1 %v388_v45  ;;  %v439_v43 = vld [vmem:[#allocation2 + $0x448] sm:$0xff]  ;;  %v441_v45 = vld [vmem:[#allocation2 + $0x458] sm:$0xff] }
 0x2d0   :  { %569 = vmatprep.subr.bf16.mxu0 %v391_v46  ;;  %692 = vmatprep.subr.bf16.mxu1 %v393_v47  ;;  %v438_v46 = vld [vmem:[#allocation2 + $0x440] sm:$0xff]  ;;  %v440_v47 = vld [vmem:[#allocation2 + $0x450] sm:$0xff] }
 0x2d3   :  { %570 = vmatpush1.bf16.msra.mxu0 %v390_v48  ;;  %693 = vmatpush1.bf16.msra.mxu1 %v392_v49  ;;  %v443_v48 = vld [vmem:[#allocation2 + $0x468] sm:$0xff]  ;;  %v442_v49 = vld [vmem:[#allocation2 + $0x460] sm:$0xff] }
 0x2d4   :  { %571 = vmatprep.subr.bf16.mxu0 %v395_v50  ;;  %694 = vmatprep.subr.bf16.mxu1 %v397_v51  ;;  %v444_v50 = vld [vmem:[#allocation2 + $0x470] sm:$0xff]  ;;  %v447_v51 = vld [vmem:[#allocation2 + $0x488] sm:$0xff] }
 0x2d7   :  { %572 = vmatpush1.bf16.msra.mxu0 %v394_v52  ;;  %695 = vmatpush1.bf16.msra.mxu1 %v396_v55  ;;  %v449_v52 = vld [vmem:[#allocation2 + $0x498] sm:$0xff]  ;;  %v448_v55 = vld [vmem:[#allocation2 + $0x490] sm:$0xff] }
 0x2d8   :  { %573 = vmatprep.subr.bf16.mxu0 %v399_v58  ;;  %696 = vmatprep.subr.bf16.mxu1 %v401_v61  ;;  %v451_v58 = vld [vmem:[#allocation2 + $0x4a8] sm:$0xff]  ;;  %v453_v61 = vld [vmem:[#allocation2 + $0x4b8] sm:$0xff] }
 0x2db   :  { %574 = vmatpush1.bf16.msra.mxu0 %v398_v63  ;;  %697 = vmatpush1.bf16.msra.mxu1 %v400_v0  ;;  %v450_v63 = vld [vmem:[#allocation2 + $0x4a0] sm:$0xff]  ;;  %v452_v0 = vld [vmem:[#allocation2 + $0x4b0] sm:$0xff] }
 0x2dc   :  { %575 = vmatprep.subr.bf16.mxu0 %v403_v2  ;;  %698 = vmatprep.subr.bf16.mxu1 %v405_v3  ;;  %v455_v2 = vld [vmem:[#allocation2 + $0x4c8] sm:$0xff]  ;;  %v457_v3 = vld [vmem:[#allocation2 + $0x4d8] sm:$0xff] }
 0x2df   :  { %576 = vmatpush1.bf16.msra.mxu0 %v402_v4  ;;  %699 = vmatpush1.bf16.msra.mxu1 %v404_v5  ;;  %v454_v4 = vld [vmem:[#allocation2 + $0x4c0] sm:$0xff]  ;;  %v456_v5 = vld [vmem:[#allocation2 + $0x4d0] sm:$0xff] }
 0x2e0   :  { %577 = vmatprep.subr.bf16.mxu0 %v407_v6  ;;  %700 = vmatprep.subr.bf16.mxu1 %v409_v7  ;;  %v459_v6 = vld [vmem:[#allocation2 + $0x4e8] sm:$0xff]  ;;  %v461_v7 = vld [vmem:[#allocation2 + $0x4f8] sm:$0xff] }
 0x2e3   :  { %578 = vmatpush1.bf16.msra.mxu0 %v406_v8  ;;  %701 = vmatpush1.bf16.msra.mxu1 %v408_v9  ;;  %v458_v8 = vld [vmem:[#allocation2 + $0x4e0] sm:$0xff]  ;;  %v460_v9 = vld [vmem:[#allocation2 + $0x4f0] sm:$0xff] }
 0x2e4   :  { %579 = vmatprep.subr.bf16.mxu0 %v411_v34  ;;  %702 = vmatprep.subr.bf16.mxu1 %v413_v10  ;;  %v463_v34 = vld [vmem:[#allocation2 + $0x508] sm:$0xff]  ;;  %v465_v10 = vld [vmem:[#allocation2 + $0x518] sm:$0xff] }
 0x2e7   :  { %580 = vmatpush1.bf16.msra.mxu0 %v410_v11  ;;  %703 = vmatpush1.bf16.msra.mxu1 %v412_v12  ;;  %v462_v11 = vld [vmem:[#allocation2 + $0x500] sm:$0xff]  ;;  %v464_v12 = vld [vmem:[#allocation2 + $0x510] sm:$0xff] }
 0x2e8   :  { %581 = vmatprep.subr.bf16.mxu0 %v415_v13  ;;  %704 = vmatprep.subr.bf16.mxu1 %v417_v14  ;;  %v467_v13 = vld [vmem:[#allocation2 + $0x528] sm:$0xff]  ;;  %v469_v14 = vld [vmem:[#allocation2 + $0x538] sm:$0xff] }
 0x2eb   :  { %582 = vmatpush1.bf16.msra.mxu0 %v414_v15  ;;  %705 = vmatpush1.bf16.msra.mxu1 %v416_v16  ;;  %v466_v15 = vld [vmem:[#allocation2 + $0x520] sm:$0xff]  ;;  %v468_v16 = vld [vmem:[#allocation2 + $0x530] sm:$0xff] }
 0x2ec   :  { %583 = vmatprep.subr.bf16.mxu0 %v419_v17  ;;  %706 = vmatprep.subr.bf16.mxu1 %v421_v18  ;;  %v471_v17 = vld [vmem:[#allocation2 + $0x548] sm:$0xff]  ;;  %v473_v18 = vld [vmem:[#allocation2 + $0x558] sm:$0xff] }
 0x2ef   :  { %584 = vmatpush1.bf16.msra.mxu0 %v418_v19  ;;  %707 = vmatpush1.bf16.msra.mxu1 %v420_v20  ;;  %v470_v19 = vld [vmem:[#allocation2 + $0x540] sm:$0xff]  ;;  %v472_v20 = vld [vmem:[#allocation2 + $0x550] sm:$0xff] }
 0x2f0   :  { %585 = vmatprep.subr.bf16.mxu0 %v423_v21  ;;  %708 = vmatprep.subr.bf16.mxu1 %v425_v22  ;;  %v475_v21 = vld [vmem:[#allocation2 + $0x568] sm:$0xff]  ;;  %v477_v22 = vld [vmem:[#allocation2 + $0x578] sm:$0xff] }
 0x2f3   :  { %586 = vmatpush1.bf16.msra.mxu0 %v422_v23  ;;  %709 = vmatpush1.bf16.msra.mxu1 %v424_v24  ;;  %v474_v23 = vld [vmem:[#allocation2 + $0x560] sm:$0xff]  ;;  %v476_v24 = vld [vmem:[#allocation2 + $0x570] sm:$0xff] }
 0x2f4   :  { %587 = vmatprep.subr.bf16.mxu0 %v427_v25  ;;  %710 = vmatprep.subr.bf16.mxu1 %v429_v26  ;;  %v479_v25 = vld [vmem:[#allocation2 + $0x588] sm:$0xff]  ;;  %v481_v26 = vld [vmem:[#allocation2 + $0x598] sm:$0xff] }
 0x2f7   :  { %588 = vmatpush1.bf16.msra.mxu0 %v426_v27  ;;  %711 = vmatpush1.bf16.msra.mxu1 %v428_v33  ;;  %v478_v27 = vld [vmem:[#allocation2 + $0x580] sm:$0xff]  ;;  %v480_v33 = vld [vmem:[#allocation2 + $0x590] sm:$0xff] }
 0x2f8   :  { %598 = vmatprep.subr.bf16.mxu0 %v431_v28  ;;  %721 = vmatprep.subr.bf16.mxu1 %v433_v29  ;;  %v483_v28 = vld [vmem:[#allocation2 + $0x5a8] sm:$0xff]  ;;  %v485_v29 = vld [vmem:[#allocation2 + $0x5b8] sm:$0xff] }
 0x2fa   :  { %590 = vmatmul.mubr.bf16.vlgmr.msra.gmra.mrb[0].mxu0 %v1612_v35  ;;  %713 = vmatmul.mubr.bf16.vlgmr.msra.gmra.mrb[0].mxu1 %v1612_v35  ;;  %v445_v35 = vld [vmem:[#allocation2 + $0x478] sm:$0xff] }
 0x2fb   :  { %599 = vmatpush1.bf16.msra.mxu0 %v430_v30  ;;  %722 = vmatpush1.bf16.msra.mxu1 %v432_v31  ;;  %v482_v30 = vld [vmem:[#allocation2 + $0x5a0] sm:$0xff]  ;;  %v484_v31 = vld [vmem:[#allocation2 + $0x5b0] sm:$0xff] }
 0x2fc   :  { %600 = vmatprep.subr.bf16.mxu0 %v435_v36  ;;  %723 = vmatprep.subr.bf16.mxu1 %v437_v32  ;;  %v487_v36 = vld [vmem:[#allocation2 + $0x5c8] sm:$0xff]  ;;  %v489_v32 = vld [vmem:[#allocation2 + $0x5d8] sm:$0xff] }
 0x2fd   :  { %630 = vmatprep.mubr.bf16.mxu0 %v1621_v38  ;;  %753 = vmatprep.mubr.bf16.mxu1 %v1621_v38  ;;  %v446_v38 = vld [vmem:[#allocation2 + $0x480] sm:$0xff] }
 0x2ff   :  { %601 = vmatpush1.bf16.msra.mxu0 %v434_v39  ;;  %724 = vmatpush1.bf16.msra.mxu1 %v436_v40  ;;  %v486_v39 = vld [vmem:[#allocation2 + $0x5c0] sm:$0xff]  ;;  %v488_v40 = vld [vmem:[#allocation2 + $0x5d0] sm:$0xff] }
 0x300   :  { %602 = vmatprep.subr.bf16.mxu0 %v439_v43  ;;  %725 = vmatprep.subr.bf16.mxu1 %v441_v45  ;;  %v491_v43 = vld [vmem:[#allocation2 + $0x5e8] sm:$0xff]  ;;  %v493_v45 = vld [vmem:[#allocation2 + $0x5f8] sm:$0xff] }
 0x303   :  { %603 = vmatpush1.bf16.msra.mxu0 %v438_v46  ;;  %726 = vmatpush1.bf16.msra.mxu1 %v440_v47  ;;  %v490_v46 = vld [vmem:[#allocation2 + $0x5e0] sm:$0xff]  ;;  %v492_v47 = vld [vmem:[#allocation2 + $0x5f0] sm:$0xff] }
 0x304   :  { %604 = vmatprep.subr.bf16.mxu0 %v443_v48  ;;  %727 = vmatprep.subr.bf16.mxu1 %v445_v35  ;;  %v498_v48 = vsub.s32 0, %v1626_v41  ;;  %v494_v35 = vld [vmem:[%s1854_s10] sm:$0xf]  ;;  %s1475_s10 = smov 8  }
 0x305   :  { %915 = vrot.lane.b32.xlu1 %v1632_v44, %s1475_s10 }
 0x307   :  { %605 = vmatpush1.bf16.msra.mxu0 %v442_v49  ;;  %728 = vmatpush1.bf16.msra.mxu1 %v444_v50  ;;  %v502_v49 = vsub.s32 1, %v1626_v41  ;;  %v506_v50 = vsub.s32 2, %v1626_v41 }
 0x308   :  { %606 = vmatprep.subr.bf16.mxu0 %v447_v51  ;;  %729 = vmatprep.subr.bf16.mxu1 %v449_v52  ;;  %v510_v51 = vsub.s32 3, %v1626_v41  ;;  %v499_v52 = vrot.slane %v494_v35, %v498_v48 }
 0x30b   :  { %607 = vmatpush1.bf16.msra.mxu0 %v446_v38  ;;  %730 = vmatpush1.bf16.msra.mxu1 %v448_v55  ;;  %v503_v38 = vrot.slane %v494_v35, %v502_v49  ;;  %v507_v55 = vrot.slane %v494_v35, %v506_v50 }
 0x30c   :  { %608 = vmatprep.subr.bf16.mxu0 %v451_v58  ;;  %731 = vmatprep.subr.bf16.mxu1 %v453_v61 }
 0x30f   :  { %609 = vmatpush1.bf16.msra.mxu0 %v450_v63  ;;  %732 = vmatpush1.bf16.msra.mxu1 %v452_v0  ;;  %v511_v63 = vrot.slane %v494_v35, %v510_v51 }
 0x310   :  { %610 = vmatprep.subr.bf16.mxu0 %v455_v2  ;;  %733 = vmatprep.subr.bf16.mxu1 %v457_v3 }
 0x313   :  { %611 = vmatpush1.bf16.msra.mxu0 %v454_v4  ;;  %734 = vmatpush1.bf16.msra.mxu1 %v456_v5 }
 0x314   :  { %612 = vmatprep.subr.bf16.mxu0 %v459_v6  ;;  %735 = vmatprep.subr.bf16.mxu1 %v461_v7 }
 0x317   :  { %613 = vmatpush1.bf16.msra.mxu0 %v458_v8  ;;  %736 = vmatpush1.bf16.msra.mxu1 %v460_v9 }
 0x318   :  { %614 = vmatprep.subr.bf16.mxu0 %v463_v34  ;;  %737 = vmatprep.subr.bf16.mxu1 %v465_v10 }
 0x31b   :  { %615 = vmatpush1.bf16.msra.mxu0 %v462_v11  ;;  %738 = vmatpush1.bf16.msra.mxu1 %v464_v12 }
 0x31c   :  { %616 = vmatprep.subr.bf16.mxu0 %v467_v13  ;;  %739 = vmatprep.subr.bf16.mxu1 %v469_v14  ;;  %v785_v14 = vpack.c.bf16 %v1668_v1, %v1664_v60 }
 0x31f   :  { %617 = vmatpush1.bf16.msra.mxu0 %v466_v15  ;;  %740 = vmatpush1.bf16.msra.mxu1 %v468_v16  ;;  %v784_v15 = vpack.c.bf16 %v1666_v62, %v1662_v59 }
 0x320   :  { %618 = vmatprep.subr.bf16.mxu0 %v471_v17  ;;  %741 = vmatprep.subr.bf16.mxu1 %v473_v18 }
 0x323   :  { %619 = vmatpush1.bf16.msra.mxu0 %v470_v19  ;;  %742 = vmatpush1.bf16.msra.mxu1 %v472_v20 }
 0x324   :  { %620 = vmatprep.subr.bf16.mxu0 %v475_v21  ;;  %743 = vmatprep.subr.bf16.mxu1 %v477_v22 }
 0x327   :  { %621 = vmatpush1.bf16.msra.mxu0 %v474_v23  ;;  %744 = vmatpush1.bf16.msra.mxu1 %v476_v24 }
 0x328   :  { %622 = vmatprep.subr.bf16.mxu0 %v479_v25  ;;  %745 = vmatprep.subr.bf16.mxu1 %v481_v26 }
 0x32b   :  { %623 = vmatpush1.bf16.msra.mxu0 %v478_v27  ;;  %746 = vmatpush1.bf16.msra.mxu1 %v480_v33 }
 0x32c   :  { %624 = vmatprep.subr.bf16.mxu0 %v483_v28  ;;  %747 = vmatprep.subr.bf16.mxu1 %v485_v29 }
 0x32f   :  { %625 = vmatpush1.bf16.msra.mxu0 %v482_v30  ;;  %748 = vmatpush1.bf16.msra.mxu1 %v484_v31 }
 0x330   :  { %626 = vmatprep.subr.bf16.mxu0 %v487_v36  ;;  %749 = vmatprep.subr.bf16.mxu1 %v489_v32 }
 0x333   :  { %627 = vmatpush1.bf16.msra.mxu0 %v486_v39  ;;  %750 = vmatpush1.bf16.msra.mxu1 %v488_v40 }
 0x334   :  { %628 = vmatprep.subr.bf16.mxu0 %v491_v43  ;;  %751 = vmatprep.subr.bf16.mxu1 %v493_v45 }
 0x337   :  { %629 = vmatpush1.bf16.msra.mxu0 %v490_v46  ;;  %752 = vmatpush1.bf16.msra.mxu1 %v492_v47 }
 0x338   :  { %788 = vmatprep.subr.bf16.mxu0 %v785_v14  ;;  %1230 = vmatprep.subr.bf16.mxu1 %v785_v14 }
 0x33a   :  { %631 = vmatmul.mubr.bf16.vlgmr.msra.gmra.mrb[0].mxu0 %v1618_v37  ;;  %754 = vmatmul.mubr.bf16.vlgmr.msra.gmra.mrb[0].mxu1 %v1618_v37 }
 0x340   :  { %789 = vmatpush1.bf16.xpose.msra.mxu0 %v784_v15  ;;  %1232 = vmatpush1.bf16.xpose.msra.mxu1 %v784_v15 }
 0x377   :  { %v916_v33 = vpop.permute.xlu1 %915 }
 0x40d   :  { %v632_v58 = vpop.f32.mrb[0].mxu0  ;;  %v755_v61 = vpop.f32.mrb[0].mxu1 }
 0x40e   :  { %v1234_v0 = vadd.f32 %v632_v58, %v499_v52  ;;  %v634_v37 = vpop.f32.mrb[1].mxu0  ;;  %v756_v2 = vpop.f32.mrb[1].mxu1 }
 0x40f   :  { %v1235_v3 = vadd.f32 %v634_v37, %v503_v38  ;;  %v636_v4 = vpop.f32.mrb[2].mxu0  ;;  %v757_v5 = vpop.f32.mrb[2].mxu1 }
 0x410   :  { %v1236_v6 = vadd.f32 %v757_v5, %v507_v55  ;;  %v637_v7 = vpop.f32.mrb[3].mxu0  ;;  %v759_v8 = vpop.f32.mrb[3].mxu1  ;;  %v762_v9 = vmul.f32 %v1234_v0, %v1234_v0 }
 0x411   :  { %v1237_v34 = vadd.f32 %v759_v8, %v511_v63  ;;  %v763_v10 = vmul.f32 %v1235_v3, %v1235_v3 }
 0x412   :  { %v771_v11 = vmul.f32 %v1236_v6, %v1236_v6 }
 0x413   :  { %v772_v41 = vmul.f32 %v1237_v34, %v1237_v34  ;;  %v764_v12 = vadd.f32 %v763_v10, %v762_v9 }
 0x415   :  { %765 = vadd.xlane.f32.xlu0 %v764_v12  ;;  %v773_v13 = vadd.f32 %v772_v41, %v771_v11 }
 0x419   :  { %774 = vadd.xlane.f32.xlu0 %v773_v13 }
 0x4a2   :  { %v766_v16 = vpop.xlane.xlu0 %765 }
 0x4a3   :  { %v767_v17 = vmax.f32 %v766_v16, 1e-24 }
 0x4a5   :  { %1309 = vrsqrt.f32 %v767_v17 }
 0x4a6   :  { %v775_v18 = vpop.xlane.xlu0 %774 }
 0x4a7   :  { %v776_v19 = vmax.f32 %v775_v18, 1e-24 }
 0x4a9   :  { %1311 = vrsqrt.f32 %v776_v19 }
 0x4af   :  { %v1310_v20 = vpop.eup %1309 }
 0x4b0   :  { %v770_v21 = vmul.f32 %v1310_v20, %v1235_v3  ;;  %v769_v62 = vmul.f32 %v1310_v20, %v1234_v0 }
 0x4b2   :  { %v781_v60 = vpack.c.bf16 %v770_v21, %v1656_v54  ;;  %v780_v26 = vpack.c.bf16 %v769_v62, %v1654_v53 }
 0x4b3   :  { %v1312_v1 = vpop.eup %1311 }
 0x4b4   :  { %820 = vmatprep.mubr.bf16.mxu0 %v781_v60  ;;  %v779_v59 = vmul.f32 %v1312_v1, %v1237_v34  ;;  %v778_v22 = vmul.f32 %v1312_v1, %v1236_v6 }
 0x4b6   :  { %v787_v23 = vpack.c.bf16 %v779_v59, %v770_v21  ;;  %v783_v24 = vpack.c.bf16 %v1660_v57, %v779_v59  ;;  %v786_v25 = vpack.c.bf16 %v778_v22, %v769_v62  ;;  %v782_v27 = vpack.c.bf16 %v1658_v56, %v778_v22 }
 0x4b8   :  { %790 = vmatprep.subr.bf16.mxu0 %v787_v23  ;;  %1231 = vmatprep.subr.bf16.mxu1 %v787_v23 }
 0x4b9   :  { %828 = vmatprep.mubr.bf16.mxu1 %v783_v24  ;;  %791 = vmatpush1.bf16.xpose.msra.mxu0 %v786_v25 }
 0x4ba   :  { %1233 = vmatpush1.bf16.xpose.msra.mxu1 %v786_v25 }
 0x4c0   :  { %821 = vmatmul.mubr.bf16.vlgmr.msra.gmra.mrb[4].mxu0 %v780_v26 }
 0x4c1   :  { %829 = vmatmul.mubr.bf16.vlgmr.msra.gmra.mrb[4].mxu1 %v782_v27 }
 0x593   :  { %v822_v54 = vpop.f32.mrb[4].mxu0 }
 0x594   :  { %v1705_v28 = vpop.f32.mrb[4].mxu1  ;;  %v824_v29 = vpop.f32.mrb[5].mxu0  ;;  %v1733_v61 = vmul.f32 10.0, %v822_v54 }
 0x595   :  { %v1708_v30 = vmul.f32 10.0, %v1705_v28  ;;  %v832_v57 = vpop.f32.mrb[5].mxu1  ;;  %v1710_v31 = vpop.f32.mrb[6].mxu0 }
 0x596   :  { %v833_v36 = vpop.f32.mrb[6].mxu1  ;;  %v827_v32 = vpop.f32.mrb[7].mxu0  ;;  %v1738_v37 = vmul.f32 10.0, %v1710_v31  ;;  %v1742_v2 = vsel %vm842_vm5, %v1733_v61, -inf }
 0x597   :  { %v1033_v39 = vmul.f32 %v916_v33, %v1708_v30  ;;  %v835_v53 = vpop.f32.mrb[7].mxu1  ;;  %v840_v38 = vmul.f32 10.0, %v833_v36  ;;  %v1041_v3 = vsel %vm926_vm6, %v1708_v30, -inf }
 0x598   :  { %v1007_v4 = vsel %vm842_vm5, %v1738_v37, -inf }
 0x599   :  { %1035 = vrot.lane.b32.xlu1 %v1033_v39, %s1476_s19  ;;  %v927_v0 = vsel %vm926_vm6, %v840_v38, -inf  ;;  %v918_v7 = vmul.f32 %v916_v33, %v840_v38 }
 0x59a   :  { %v964_v8 = vrot.slane %v927_v0, 4 }
 0x59c   :  { %v965_v9 = vmax.f32 %v927_v0, %v964_v8 }
 0x59d   :  { %1129 = vrot.lane.b32.xlu1 %v1632_v44, %s1477_s21 }
 0x59e   :  { %v966_v41 = vrot.slane %v965_v9, 2 }
 0x5a0   :  { %v967_v16 = vmax.f32 %v965_v9, %v966_v41 }
 0x5a1   :  { %1112 = vrot.lane.b32.xlu1 %v1632_v44, %s1478_s5 }
 0x5a2   :  { %v968_v20 = vrot.slane %v967_v16, 1 }
 0x5a4   :  { %v969_v1 = vmax.f32 %v967_v16, %v968_v20 }
 0x5a6   :  { %v970_v62 = vsub.f32 %v840_v38, %v969_v1 }
 0x5a8   :  { %v971_v23 = vmul.f32 1.442695, %v970_v62 }
 0x60b   :  { %v1036_v56 = vpop.permute.xlu1 %1035 }
 0x60c   :  { %v1038_v40 = vsel %vm842_vm5, %v1036_v56, 0.0  ;;  %v957_v56 = vsel %vm926_vm6, %v918_v7, 0.0 }
 0x60d   :  { %1039 = vadd.xlane.f32.xlu0 %v1038_v40 }
 0x60f   :  { %v1130_v43 = vpop.permute.xlu1 %1129 }
 0x610   :  { %v1132_v45 = vmul.f32 %v1130_v43, %v1705_v28 }
 0x612   :  { %1134 = vrot.lane.b32.xlu1 %v1132_v45, %s1479_s2 }
 0x613   :  { %v1113_v48 = vpop.permute.xlu1 %1112 }
 0x614   :  { %v1115_v35 = vmul.f32 %v1113_v48, %v1710_v31 }
 0x684   :  { %v1135_v49 = vpop.permute.xlu1 %1134 }
 0x685   :  { %v1137_v50 = vsel %vm842_vm5, %v1135_v49, 0.0 }
 0x69a   :  { %v1720_v46 = vpop.xlane.xlu0 %1039 }
 0x69b   :  { %v1071_v47 = vmul.f32 %v1632_v44, %v1720_v46 }
 0x69d   :  { %1073 = vrot.lane.b32.xlu0 %v1071_v47, %s1475_s10 }
 0x6a1   :  { %1117 = vrot.lane.b32.xlu0 %v1115_v35, %s1480_s18 }
 0x6c0   :  { %1138 = vadd.xlane.f32.xlu0 %v1137_v50 }
 0x70f   :  { %v1074_v51 = vpop.permute.xlu0 %1073 }
 0x710   :  { %v1729_v52 = vsub.f32 %v1708_v30, %v1074_v51 }
 0x712   :  { %v1077_v55 = vsel %vm926_vm6, %v1729_v52, -inf }
 0x713   :  { %1078 = vmax.xlane.f32.xlu1 %v1077_v55  ;;  %v1118_v58 = vpop.permute.xlu0 %1117 }
 0x714   :  { %v1120_v63 = vsel %vm842_vm5, %v1118_v58, 0.0 }
 0x715   :  { %1121 = vadd.xlane.f32.xlu0 %v1120_v63 }
 0x717   :  { %928 = vmax.xlane.f32.xlu1 %v927_v0 }
 0x719   :  { %847 = vmax.xlane.f32.xlu0 %v1742_v2 }
 0x71b   :  { %1042 = vmax.xlane.f32.xlu1 %v1041_v3 }
 0x71d   :  { %1008 = vmax.xlane.f32.xlu0 %v1007_v4 }
 0x74d   :  { %v1139_v5 = vpop.xlane.xlu0 %1138 }
 0x74e   :  { %v1140_v6 = vmul.f32 %v1632_v44, %v1139_v5 }
 0x750   :  { %1142 = vrot.lane.b32.xlu0 %v1140_v6, %s1477_s21 }
 0x754   :  { %920 = vrot.lane.b32.xlu0 %v918_v7, %s1476_s19 }
 0x7a0   :  { %v1752_v34 = vpop.xlane.xlu1 %1078 }
 0x7a1   :  { %v1080_v10 = vsub.f32 %v1729_v52, %v1752_v34 }
 0x7a2   :  { %v1122_v11 = vpop.xlane.xlu0 %1121 }
 0x7a3   :  { %v1081_v12 = vmul.f32 1.442695, %v1080_v10  ;;  %v1123_v13 = vmul.f32 %v1632_v44, %v1122_v11  ;;  %v841_v11 = vmul.f32 %v1632_v44, %v1733_v61 }
 0x7a4   :  { %v1757_v14 = vpop.xlane.xlu1 %928 }
 0x7a5   :  { %1313 = vpow2.f32 %v1081_v12  ;;  %v930_v15 = vsub.f32 %v840_v38, %v1757_v14  ;;  %1125 = vrot.lane.b32.xlu0 %v1123_v13, %s1478_s5  ;;  %v1789_v41 = vsel %vm842_vm5, %v841_v11, 0.0 }
 0x7a6   :  { %v1767_v24 = vpop.xlane.xlu0 %847 }
 0x7a7   :  { %v931_v17 = vmul.f32 1.442695, %v930_v15  ;;  %v1003_v15 = vmul.f32 %v1632_v44, %v1738_v37 }
 0x7a8   :  { %v1761_v18 = vpop.xlane.xlu1 %1042 }
 0x7a9   :  { %1315 = vpow2.f32 %v931_v17  ;;  %v1044_v19 = vsub.f32 %v1708_v30, %v1761_v18  ;;  %v849_v30 = vsub.f32 %v1733_v61, %v1767_v24  ;;  %v1004_v16 = vsel %vm842_vm5, %v1003_v15, 0.0 }
 0x7aa   :  { %v1770_v25 = vpop.xlane.xlu0 %1008  ;;  %v878_v17 = vrot.slane %v1742_v2, 4 }
 0x7ab   :  { %v1045_v21 = vmul.f32 1.442695, %v1044_v19  ;;  %v850_v36 = vmul.f32 1.442695, %v849_v30  ;;  %v1010_v63 = vsub.f32 %v1738_v37, %v1770_v25 }
 0x7ac   :  { %v879_v19 = vmax.f32 %v1742_v2, %v878_v17 }
 0x7ad   :  { %1317 = vpow2.f32 %v1045_v21  ;;  %v1011_v0 = vmul.f32 1.442695, %v1010_v63 }
 0x7ae   :  { %1319 = vpow2.f32 %v971_v23  ;;  %v880_v20 = vrot.slane %v879_v19, 2 }
 0x7af   :  { %v1314_v60 = vpop.eup %1313  ;;  %1321 = vpow2.f32 %v850_v36 }
 0x7b0   :  { %1084 = vrot.lane.b32.xlu1 %v1314_v60, %s1476_s19  ;;  %v881_v21 = vmax.f32 %v879_v19, %v880_v20 }
 0x7b2   :  { %v882_v60 = vrot.slane %v881_v21, 1 }
 0x7b3   :  { %v1316_v59 = vpop.eup %1315 }
 0x7b4   :  { %934 = vrot.lane.b32.xlu1 %v1316_v59, %s1476_s19 }
 0x7b7   :  { %v1318_v22 = vpop.eup %1317 }
 0x7b8   :  { %1048 = vrot.lane.b32.xlu1 %v1318_v22, %s1476_s19  ;;  %v1320_v54 = vpop.eup %1319 }
 0x7b9   :  { %v973_v33 = vsel %vm926_vm6, %v1320_v54, 0.0  ;;  %v1322_v43 = vpop.eup %1321 }
 0x7ba   :  { %v974_v29 = vrot.slane %v973_v33, 4  ;;  %v852_v45 = vsel %vm842_vm5, %v1322_v43, 0.0 }
 0x7bc   :  { %v975_v57 = vadd.f32 %v974_v29, %v973_v33 }
 0x7be   :  { %v976_v32 = vrot.slane %v975_v57, 2 }
 0x7c0   :  { %v977_v39 = vadd.f32 %v976_v32, %v975_v57 }
 0x7c2   :  { %v1143_v26 = vpop.permute.xlu0 %1142  ;;  %v978_v53 = vrot.slane %v977_v39, 1 }
 0x7c3   :  { %v1145_v27 = vsub.f32 %v1705_v28, %v1143_v26  ;;  %v958_v28 = vrot.slane %v957_v56, 4 }
 0x7c4   :  { %v979_v40 = vadd.f32 %v978_v53, %v977_v39 }
 0x7c5   :  { %1147 = vrot.lane.b32.xlu0 %v1145_v27, %s1476_s19  ;;  %v959_v47 = vadd.f32 %v958_v28, %v957_v56 }
 0x7c6   :  { %1323 = vlog2.f32 %v979_v40  ;;  %v921_v12 = vpop.permute.xlu0 %920 }
 0x7c7   :  { %v960_v48 = vrot.slane %v959_v47, 2  ;;  %1325 = vpow2.f32 %v1011_v0  ;;  %v923_v13 = vsel %vm842_vm5, %v921_v12, 0.0 }
 0x7c9   :  { %v961_v49 = vadd.f32 %v960_v48, %v959_v47 }
 0x7cb   :  { %v962_v51 = vrot.slane %v961_v49, 1 }
 0x7cd   :  { %v963_v55 = vadd.f32 %v962_v51, %v961_v49 }
 0x7d0   :  { %v1324_v35 = vpop.eup %1323 }
 0x7d1   :  { %v981_v50 = vmul.f32 0.6931472, %v1324_v35  ;;  %v1326_v7 = vpop.eup %1325 }
 0x7d2   :  { %v1013_v8 = vsel %vm842_vm5, %v1326_v7, 0.0 }
 0x7d3   :  { %v982_v38 = vadd.f32 %v981_v50, %v969_v1  ;;  %v1798_v1 = vmax.f32 %v881_v21, %v882_v60 }
 0x7d5   :  { %v983_v58 = vsub.f32 %v982_v38, %v963_v55  ;;  %v884_v59 = vsub.f32 %v1733_v61, %v1798_v1 }
 0x7d7   :  { %v885_v22 = vmul.f32 1.442695, %v884_v59 }
 0x7d9   :  { %1327 = vpow2.f32 %v885_v22 }
 0x7e3   :  { %v1328_v26 = vpop.eup %1327 }
 0x7e4   :  { %853 = vadd.xlane.f32.xlu0 %v852_v45  ;;  %v887_v2 = vsel %vm842_vm5, %v1328_v26, 0.0 }
 0x7e5   :  { %v888_v29 = vrot.slane %v887_v2, 4 }
 0x7e7   :  { %v889_v32 = vadd.f32 %v888_v29, %v887_v2 }
 0x7e9   :  { %v890_v45 = vrot.slane %v889_v32, 2 }
 0x7fa   :  { %985 = vrot.lane.b32.xlu0 %v983_v58, %s1476_s19 }
 0x817   :  { %v1126_v62 = vpop.permute.xlu0 %1125 }
 0x818   :  { %v1128_v48 = vsub.f32 %v1710_v31, %v1126_v62 }
 0x822   :  { %v1085_v3 = vpop.permute.xlu1 %1084 }
 0x823   :  { %v1087_v4 = vsel %vm842_vm5, %v1085_v3, 0.0 }
 0x824   :  { %1088 = vadd.xlane.f32.xlu1 %v1087_v4 }
 0x826   :  { %v935_v5 = vpop.permute.xlu1 %934 }
 0x827   :  { %v937_v6 = vsel %vm842_vm5, %v935_v5, 0.0  ;;  %v872_v5 = vrot.slane %v1789_v41, 4 }
 0x828   :  { %938 = vadd.xlane.f32.xlu1 %v937_v6 }
 0x829   :  { %v873_v6 = vadd.f32 %v872_v5, %v1789_v41 }
 0x82a   :  { %v1049_v9 = vpop.permute.xlu1 %1048 }
 0x82b   :  { %v1051_v10 = vsel %vm842_vm5, %v1049_v9, 0.0  ;;  %v874_v7 = vrot.slane %v873_v6, 2 }
 0x82c   :  { %1014 = vadd.xlane.f32.xlu1 %v1013_v8 }
 0x82d   :  { %v875_v9 = vadd.f32 %v874_v7, %v873_v6 }
 0x82f   :  { %v876_v11 = vrot.slane %v875_v9, 1 }
 0x830   :  { %1052 = vadd.xlane.f32.xlu1 %v1051_v10 }
 0x834   :  { %844 = vadd.xlane.f32.xlu1 %v1789_v41 }
 0x837   :  { %v1148_v23 = vpop.permute.xlu0 %1147 }
 0x838   :  { %924 = vadd.xlane.f32.xlu1 %v923_v13  ;;  %v1150_v50 = vmul.f32 %v1148_v23, %v1128_v48 }
 0x83c   :  { %1005 = vadd.xlane.f32.xlu1 %v1004_v16 }
 0x871   :  { %v854_v44 = vpop.xlane.xlu0 %853 }
 0x872   :  { %1329 = vlog2.f32 %v854_v44 }
 0x875   :  { %v986_v55 = vpop.permute.xlu0 %985 }
 0x87c   :  { %v1330_v54 = vpop.eup %1329 }
 0x87d   :  { %v856_v57 = vmul.f32 0.6931472, %v1330_v54 }
 0x87f   :  { %v857_v56 = vadd.f32 %v856_v57, %v1767_v24 }
 0x8b1   :  { %v1089_v37 = vpop.xlane.xlu1 %1088 }
 0x8b2   :  { %1331 = vlog2.f32 %v1089_v37 }
 0x8b5   :  { %v939_v27 = vpop.xlane.xlu1 %938 }
 0x8b6   :  { %1333 = vlog2.f32 %v939_v27 }
 0x8b9   :  { %v1015_v33 = vpop.xlane.xlu1 %1014 }
 0x8bc   :  { %v1332_v30 = vpop.eup %1331 }
 0x8bd   :  { %v1091_v36 = vmul.f32 0.6931472, %v1332_v30  ;;  %v1053_v61 = vpop.xlane.xlu1 %1052 }
 0x8be   :  { %1335 = vlog2.f32 %v1053_v61 }
 0x8bf   :  { %v1092_v39 = vadd.f32 %v1091_v36, %v1752_v34  ;;  %v891_v34 = vadd.f32 %v890_v45, %v889_v32 }
 0x8c0   :  { %v1334_v53 = vpop.eup %1333 }
 0x8c1   :  { %v941_v40 = vmul.f32 0.6931472, %v1334_v53  ;;  %v845_v43 = vpop.xlane.xlu1 %844  ;;  %v1093_v28 = vsub.f32 %v1729_v52, %v1092_v39  ;;  %v892_v31 = vrot.slane %v891_v34, 1 }
 0x8c2   :  { %v858_v47 = vsub.f32 %v857_v56, %v845_v43 }
 0x8c3   :  { %1095 = vrot.lane.b32.xlu1 %v1093_v28, %s1476_s19  ;;  %v942_v35 = vadd.f32 %v941_v40, %v1757_v14  ;;  %v988_v14 = vsel %vm898_vm7, %v986_v55, 0.0  ;;  %v893_v3 = vadd.f32 %v892_v31, %v891_v34 }
 0x8c4   :  { %v859_v49 = vsel %vm208_vm4, %v858_v47, 0.0 }
 0x8c5   :  { %v925_v51 = vpop.xlane.xlu1 %924  ;;  %860 = vadd.xlane.f32.xlu0 %v859_v49  ;;  %1337 = vlog2.f32 %v893_v3 }
 0x8c6   :  { %v943_v38 = vsub.f32 %v942_v35, %v925_v51  ;;  %1339 = vlog2.f32 %v1015_v33 }
 0x8c7   :  { %1152 = vrot.lane.b32.xlu1 %v1150_v50, %s1480_s18 }
 0x8c8   :  { %v1336_v24 = vpop.eup %1335  ;;  %v944_v52 = vsel %vm208_vm4, %v943_v38, 0.0 }
 0x8c9   :  { %v1055_v58 = vmul.f32 0.6931472, %v1336_v24  ;;  %945 = vadd.xlane.f32.xlu0 %v944_v52  ;;  %v1006_v17 = vpop.xlane.xlu1 %1005 }
 0x8cb   :  { %v1056_v63 = vadd.f32 %v1055_v58, %v1761_v18 }
 0x8cd   :  { %989 = vadd.xlane.f32.xlu0 %v988_v14  ;;  %v1057_v0 = vsub.f32 %v1056_v63, %v1720_v46  ;;  %v877_v46 = vadd.f32 %v876_v11, %v875_v9 }
 0x8cf   :  { %v1058_v4 = vsel %vm208_vm4, %v1057_v0, 0.0  ;;  %v1338_v8 = vpop.eup %1337 }
 0x8d0   :  { %v895_v10 = vmul.f32 0.6931472, %v1338_v8  ;;  %v1340_v18 = vpop.eup %1339 }
 0x8d1   :  { %1059 = vadd.xlane.f32.xlu0 %v1058_v4  ;;  %v1017_v12 = vmul.f32 0.6931472, %v1340_v18 }
 0x8d2   :  { %v896_v13 = vadd.f32 %v895_v10, %v1798_v1 }
 0x8d3   :  { %v1018_v15 = vadd.f32 %v1017_v12, %v1770_v25 }
 0x8d4   :  { %v897_v16 = vsub.f32 %v896_v13, %v877_v46 }
 0x8d5   :  { %v1019_v19 = vsub.f32 %v1018_v15, %v1006_v17 }
 0x8d6   :  { %v899_v20 = vsel %vm898_vm7, %v897_v16, 0.0 }
 0x8d7   :  { %v1020_v41 = vsel %vm208_vm4, %v1019_v19, 0.0 }
 0x8eb   :  { %900 = vadd.xlane.f32.xlu1 %v899_v20 }
 0x8ef   :  { %1021 = vadd.xlane.f32.xlu1 %v1020_v41  ;;  %v1187_v41 = vstv %s221_s6 }
 0x935   :  { %v1096_v21 = vpop.permute.xlu1 %1095 }
 0x936   :  { %v1098_v60 = vsel %vm842_vm5, %v1096_v21, 0.0 }
 0x937   :  { %1099 = vadd.xlane.f32.xlu1 %v1098_v60 }
 0x939   :  { %v1153_v59 = vpop.permute.xlu1 %1152 }
 0x93a   :  { %v1155_v62 = vsel %vm842_vm5, %v1153_v59, 0.0 }
 0x93b   :  { %1156 = vadd.xlane.f32.xlu0 %v1155_v62 }
 0x952   :  { %v861_v1 = vpop.xlane.xlu0 %860 }
 0x953   :  { %v862_v22 = vrot.slane %v861_v1, 4 }
 0x955   :  { %v863_v25 = vadd.f32 %v862_v22, %v861_v1 }
 0x956   :  { %v946_v27 = vpop.xlane.xlu0 %945 }
 0x957   :  { %v864_v23 = vrot.slane %v863_v25, 2  ;;  %v947_v54 = vrot.slane %v946_v27, 4 }
 0x959   :  { %v865_v44 = vadd.f32 %v864_v23, %v863_v25  ;;  %v948_v30 = vadd.f32 %v947_v54, %v946_v27  ;;  %v1205_v27 = vstv %s236_s15 }
 0x95a   :  { %v990_v2 = vpop.xlane.xlu0 %989 }
 0x95b   :  { %v866_v37 = vrot.slane %v865_v44, 1  ;;  %v991_v33 = vrot.slane %v990_v2, 4  ;;  %v949_v61 = vrot.slane %v948_v30, 2 }
 0x95d   :  { %v867_v26 = vadd.f32 %v866_v37, %v865_v44  ;;  %v992_v36 = vadd.f32 %v991_v33, %v990_v2  ;;  %v950_v45 = vadd.f32 %v949_v61, %v948_v30 }
 0x95e   :  { %v1060_v29 = vpop.xlane.xlu0 %1059 }
 0x95f   :  { %1258 = vpush %v867_v26  ;;  %v1061_v57 = vrot.slane %v1060_v29, 4  ;;  %v993_v53 = vrot.slane %v992_v36, 2  ;;  %v951_v51 = vrot.slane %v950_v45, 1 }
 0x961   :  { %v1062_v32 = vadd.f32 %v1061_v57, %v1060_v29  ;;  %v994_v35 = vadd.f32 %v993_v53, %v992_v36  ;;  %v952_v31 = vadd.f32 %v951_v51, %v950_v45 }
 0x963   :  { %v1063_v43 = vrot.slane %v1062_v32, 2  ;;  %v995_v52 = vrot.slane %v994_v35, 1 }
 0x965   :  { %v1064_v34 = vadd.f32 %v1063_v43, %v1062_v32  ;;  %v996_v14 = vadd.f32 %v995_v52, %v994_v35 }
 0x967   :  { %v1065_v63 = vrot.slane %v1064_v34, 1 }
 0x969   :  { %v1066_v4 = vadd.f32 %v1065_v63, %v1064_v34 }
 0x978   :  { %v901_v39 = vpop.xlane.xlu1 %900 }
 0x979   :  { %v902_v56 = vrot.slane %v901_v39, 4 }
 0x97b   :  { %v903_v40 = vadd.f32 %v902_v56, %v901_v39 }
 0x97c   :  { %v1022_v28 = vpop.xlane.xlu1 %1021 }
 0x97d   :  { %v904_v47 = vrot.slane %v903_v40, 2  ;;  %v1023_v48 = vrot.slane %v1022_v28, 4 }
 0x97f   :  { %v1024_v49 = vadd.f32 %v1023_v48, %v1022_v28  ;;  %v905_v50 = vadd.f32 %v904_v47, %v903_v40 }
 0x981   :  { %v1025_v38 = vrot.slane %v1024_v49, 2  ;;  %v906_v24 = vrot.slane %v905_v50, 1 }
 0x983   :  { %v907_v55 = vadd.f32 %v906_v24, %v905_v50  ;;  %v1026_v58 = vadd.f32 %v1025_v38, %v1024_v49 }
 0x985   :  { %1260 = vpush %v907_v55  ;;  %v1027_v0 = vrot.slane %v1026_v58, 1 }
 0x986   :  { %1262 = vpush %v952_v31 }
 0x987   :  { %1264 = vpush %v996_v14  ;;  %v1028_v3 = vadd.f32 %v1027_v0, %v1026_v58 }
 0x989   :  { %1266 = vpush %v1028_v3 }
 0x98a   :  { %1268 = vpush %v1066_v4 }
 0x990   :  { %s1259_s22 = spop %1258 }
 0x991   :  { %s871_s24 = smul.f32 0.125, %s1259_s22 }
 0x9b6   :  { %s1261_s0 = spop %1260 }
 0x9b7   :  { %s911_s23 = smul.f32 0.125, %s1261_s0  ;;  %s1263_s26 = spop %1262 }
 0x9b8   :  { %s1265_s9 = spop %1264  ;;  %s956_s30 = smul.f32 0.125, %s1263_s26 }
 0x9b9   :  { %s912_s27 = sadd.f32 %s911_s23, %s871_s24  ;;  %s1000_s4 = smul.f32 0.125, %s1265_s9 }
 0x9ba   :  { %s1267_s28 = spop %1266  ;;  %s1181_s23 = smul.f32 0.01, %s236_s15 }
 0x9bb   :  { %s913_s7 = smul.f32 0.5, %s912_s27  ;;  %s1269_s12 = spop %1268 }
 0x9bc   :  { %s1032_s29 = smul.f32 0.125, %s1267_s28  ;;  %s1001_s17 = sadd.f32 %s1000_s4, %s956_s30 }
 0x9bd   :  { %v1184_v19 = vstv %s913_s7  ;;  %s1171_s8 = sadd.f32 %s913_s7, %s221_s6  ;;  %s1070_s20 = smul.f32 0.125, %s1269_s12 }
 0x9be   :  { %s1172_s13 = smul.f32 0.5, %s1032_s29  ;;  %v1185_v20 = vsel %vm1183_vm8, %v1184_v19, 0.0  ;;  %v1190_v60 = vstv %s1032_s29 }
 0x9bf   :  { %v1188_v21 = vsel %vm1186_vm9, %v1187_v41, %v1185_v20  ;;  %s1174_s10 = smul.f32 0.5, %s1070_s20  ;;  %v1193_v1 = vstv %s1070_s20 }
 0x9c0   :  { %s1173_s25 = sadd.f32 %s1172_s13, %s1171_s8  ;;  %v1191_v59 = vsel %vm1189_vm10, %v1190_v60, %v1188_v21  ;;  %s1002_s6 = smul.f32 0.5, %s1001_s17 }
 0x9c1   :  { %v1194_v22 = vsel %vm1192_vm11, %v1193_v1, %v1191_v59 }
 0x9c2   :  { %s1175_s5 = sadd.f32 %s1174_s10, %s1173_s25  ;;  %v1199_v44 = vstv %s1002_s6 }
 0x9c4   :  { %v1100_v5 = vpop.xlane.xlu1 %1099 }
 0x9c5   :  { %v1101_v6 = vrot.slane %v1100_v5, 4 }
 0x9c7   :  { %v1102_v7 = vadd.f32 %v1101_v6, %v1100_v5 }
 0x9c8   :  { %v1157_v8 = vpop.xlane.xlu0 %1156 }
 0x9c9   :  { %v1103_v9 = vrot.slane %v1102_v7, 2  ;;  %v1158_v10 = vrot.slane %v1157_v8, 4 }
 0x9cb   :  { %v1104_v18 = vadd.f32 %v1103_v9, %v1102_v7  ;;  %v1159_v11 = vadd.f32 %v1158_v10, %v1157_v8 }
 0x9cd   :  { %v1160_v12 = vrot.slane %v1159_v11, 2  ;;  %v1105_v13 = vrot.slane %v1104_v18, 1 }
 0x9cf   :  { %v1161_v46 = vadd.f32 %v1160_v12, %v1159_v11  ;;  %v1106_v15 = vadd.f32 %v1105_v13, %v1104_v18 }
 0x9d1   :  { %1270 = vpush %v1106_v15  ;;  %v1162_v16 = vrot.slane %v1161_v46, 1 }
 0x9d3   :  { %v1163_v17 = vadd.f32 %v1162_v16, %v1161_v46 }
 0x9d5   :  { %1272 = vpush %v1163_v17 }
 0xa02   :  { %s1271_s3 = spop %1270 }
 0xa03   :  { %s1110_s16 = smul.f32 0.015625, %s1271_s3 }
 0xa05   :  { %s1111_s19 = ssub.f32 0.0, %s1110_s16 }
 0xa06   :  { %s1273_s21 = spop %1272 }
 0xa07   :  { %s1176_s2 = smul.f32 0.1, %s1111_s19  ;;  %v1196_v62 = vstv %s1111_s19 }
 0xa08   :  { %s1167_s1 = smul.f32 0.015625, %s1273_s21  ;;  %v1197_v25 = vsel %vm1195_vm12, %v1196_v62, %v1194_v22 }
 0xa09   :  { %s1177_s18 = sadd.f32 %s1176_s2, %s1175_s5  ;;  %v1200_v37 = vsel %vm1198_vm13, %v1199_v44, %v1197_v25 }
 0xa0a   :  { %s1170_s22 = smul.f32 0.14285715, %s1167_s1 }
 0xa0b   :  { %s1178_s0 = sadd.f32 %s1177_s18, %s1002_s6 }
 0xa0c   :  { %s1179_s24 = smul.f32 0.2, %s1170_s22  ;;  %v1202_v23 = vstv %s1170_s22 }
 0xa0d   :  { %v1203_v26 = vsel %vm1201_vm14, %v1202_v23, %v1200_v37 }
 0xa0e   :  { %s1180_s26 = sadd.f32 %s1179_s24, %s1178_s0  ;;  %v1206_v2 = vsel %vm1204_vm15, %v1205_v27, %v1203_v26 }
 0xa10   :  { %s1182_s27 = sadd.f32 %s1181_s23, %s1180_s26 }
 0xa12   :  { %v1208_v54 = vstv %s1182_s27 }
 0xa13   :  { %v1209_v33 = vsel %vm1207_vm0, %v1208_v54, %v1206_v2 }
 0xa14   :  { %1210 = vst [vmem:[%s1855_s11] sm:$0x1] %v1209_v33 }
 0xa15   :  { %1215 = vsyncpa [#allocation5], 1 }
 0xa16   :  { %1216 = vsyncpa [#allocation7], 1 }
 0xa17   :  { %1217 = vsyncpa [#allocation10], 1 }
 0xa18   :  { %1218 = vsyncmov [#allocation3] }
 0xa1b   :  { %s1219_s7 = vpop.sfrf %1218 }
 0xa1c   :  { %p1229_p12 = scmp.ne.s32.totalorder %s1219_s7, 0 }
 0xa1e   :  { %1223 = shalt.err (%p1229_p12)  }

</bundles_post_ra>
